<compile_context>
chip_gen: v5e
topology: v5e:2x2
jax: 0.10.0
libtpu: 0.0.40
codegen_flags: <defaults>
</compile_context>

<pallas_src>
import jax
import jax.numpy as jnp
from jax.experimental import pallas as pl
from jax.experimental.pallas import tpu as pltpu


def _encoder_kernel(x_ref, w_in_ref, b_in_ref, w_hh_f_ref, w_hh_b_ref,
                    w_out_ref, b_out_ref, noise_ref, out_ref, xp_ref):
    BP, Nz = noise_ref.shape            # padded batch (multiple of 8), latent dim
    H = w_hh_f_ref.shape[0]             # hidden size per direction
    H4 = 4 * H
    T = x_ref.shape[0] // BP            # sequence length

    # ---- Hoisted input projection: one matmul for all steps & both dirs ----
    # Column layout: [fwd: i|f|o|g (4H) | bwd: i|f|o|g (4H)].  Written to a
    # VMEM scratch so each step reads an aligned 8-sublane window instead of
    # keeping the whole (T*BP, 8H) value live across the unrolled loop.
    xp_ref[...] = (jnp.dot(x_ref[...], w_in_ref[...],
                           preferred_element_type=jnp.float32)
                   + b_in_ref[...])

    w_hh_f = w_hh_f_ref[...]            # (H, 4H) forward recurrent weights
    w_hh_b = w_hh_b_ref[...]            # (H, 4H) backward recurrent weights
    # NOTE: with explicit MXU staging (pltpu.matmul_push_rhs / matmul_acc_lhs /
    # matmul_pop) each direction's RHS could be pushed once and kept stationary
    # (on v5e pinned to different mxu_index); left to Mosaic here for robustness.

    zeros_state = jnp.zeros((BP, H), jnp.float32)
    h_f, c_f = zeros_state, zeros_state
    h_b, c_b = zeros_state, zeros_state

    def lstm_step(xp_t, h, c, w_hh):
        gates = xp_t + jnp.dot(h, w_hh, preferred_element_type=jnp.float32)  # (BP, 4H)
        # Gate columns are [i | f | o | g]: one full-vreg sigmoid (i/f/o live in
        # the first 3H lanes) and a tanh restricted to the g lanes only.
        sg = jax.nn.sigmoid(gates)
        i_g = sg[:, 0:H]
        f_g = sg[:, H:2 * H]
        o_g = sg[:, 2 * H:3 * H]
        g_g = jnp.tanh(gates[:, 3 * H:H4])
        c_new = f_g * c + i_g * g_g
        h_new = o_g * jnp.tanh(c_new)
        return h_new, c_new

    # ---- Fully unrolled recurrence (T is a small compile-time constant) ----
    # The forward and backward chains are independent dependency chains.
    for t in range(T):
        xp_f = xp_ref[t * BP:(t + 1) * BP, 0:H4]                  # x[t]      -> fwd
        xp_b = xp_ref[(T - 1 - t) * BP:(T - t) * BP, H4:2 * H4]   # x[T-1-t]  -> bwd
        h_f, c_f = lstm_step(xp_f, h_f, c_f, w_hh_f)
        h_b, c_b = lstm_step(xp_b, h_b, c_b, w_hh_b)

    # ---- Fused mu/sigma heads + reparameterization ----
    h_cat = jnp.concatenate([h_f, h_b], axis=1)                    # (BP, 2H)
    head = (jnp.dot(h_cat, w_out_ref[...], preferred_element_type=jnp.float32)
            + b_out_ref[...])                                      # (BP, 2Nz)
    mu = head[:, 0:Nz]
    sigma_hat = head[:, Nz:2 * Nz]
    z = mu + jnp.exp(sigma_hat * 0.5) * noise_ref[...]

    # One lane-dense store: [z | mu | sigma_hat | 0-pad] over 128+ lanes.
    extra = out_ref.shape[1] - 3 * Nz
    parts = [z, mu, sigma_hat]
    if extra:
        parts.append(jnp.zeros((BP, extra), jnp.float32))
    out_ref[...] = jnp.concatenate(parts, axis=1)


def fuse_params(params):
    """Fuse/reorder weights once at parameter-load time (block concatenates only)."""
    H = params["whh_l0"].shape[1]
    Nz = params["fc_mu_w"].shape[0]

    def reorder_ifog(m):                 # PyTorch rows [i, f, g, o] -> [i, f, o, g]
        return jnp.concatenate(
            [m[0:H], m[H:2 * H], m[3 * H:4 * H], m[2 * H:3 * H]], axis=0)

    def direction(sfx):
        w_in = reorder_ifog(params["wih_l0" + sfx]).T            # (5, 4H)
        w_hh = reorder_ifog(params["whh_l0" + sfx]).T            # (H, 4H)
        b = reorder_ifog(params["bih_l0" + sfx] + params["bhh_l0" + sfx])  # (4H,)
        return w_in, w_hh, b

    w_in_f, w_hh_f, b_f = direction("")
    w_in_b, w_hh_b, b_b = direction("_reverse")

    f32 = jnp.float32
    return {
        "w_in": jnp.concatenate([w_in_f, w_in_b], axis=1).astype(f32),     # (5, 8H)
        "b_in": jnp.concatenate([b_f, b_b]).reshape(1, 8 * H).astype(f32),
        "w_hh_f": w_hh_f.astype(f32),
        "w_hh_b": w_hh_b.astype(f32),
        "w_out": jnp.concatenate([params["fc_mu_w"].T,
                                  params["fc_sigma_w"].T], axis=1).astype(f32),
        "b_out": jnp.concatenate([params["fc_mu_b"],
                                  params["fc_sigma_b"]]).reshape(1, 2 * Nz).astype(f32),
        "H": H,
        "Nz": Nz,
    }


def encoder_rnn_forward(x, fused, noise):
    """Pallas forward pass. x: (T, B, 5) float32, noise: (B, Nz) float32."""
    T, B, F = x.shape
    H, Nz = fused["H"], fused["Nz"]
    BP = ((max(B, 8) + 7) // 8) * 8                 # pad batch to a sublane multiple
    out_lanes = max(128, ((3 * Nz + 127) // 128) * 128)

    x = x.astype(jnp.float32)
    x_p = jnp.pad(x, ((0, 0), (0, BP - B), (0, 0))).reshape(T * BP, F)
    noise_p = jnp.pad(noise.astype(jnp.float32), ((0, BP - B), (0, 0)))

    operands = (x_p, fused["w_in"], fused["b_in"], fused["w_hh_f"],
                fused["w_hh_b"], fused["w_out"], fused["b_out"], noise_p)

    out = pl.pallas_call(
        _encoder_kernel,
        out_shape=jax.ShapeDtypeStruct((BP, out_lanes), jnp.float32),
        grid=(1,),
        in_specs=[pl.BlockSpec(a.shape, lambda i: (0, 0)) for a in operands],
        out_specs=pl.BlockSpec((BP, out_lanes), lambda i: (0, 0)),
        scratch_shapes=[pltpu.VMEM((T * BP, 8 * H), jnp.float32)],
        compiler_params=pltpu.CompilerParams(
            # Single tiny problem -> one sequential grid point.  With many
            # independent sequences, add a leading batch grid axis marked
            # "parallel" instead (also lets both v7x TensorCores participate).
            dimension_semantics=("arbitrary",)),
    )(*operands)

    z = out[:B, 0:Nz]
    mu = out[:B, Nz:2 * Nz]
    sigma_hat = out[:B, 2 * Nz:3 * Nz]
    return z, mu, sigma_hat


def encoder_rnn_reference(x, params, noise):
    """Pure-JAX reference (same semantics as the PyTorch module)."""
    T, B, _ = x.shape
    H = params["whh_l0"].shape[1]

    def run_dir(xs, suffix):
        wih = params["wih_l0" + suffix]
        whh = params["whh_l0" + suffix]
        b = params["bih_l0" + suffix] + params["bhh_l0" + suffix]

        def cell(carry, x_t):
            h, c = carry
            g = x_t @ wih.T + h @ whh.T + b
            i = jax.nn.sigmoid(g[:, :H])
            f = jax.nn.sigmoid(g[:, H:2 * H])
            gg = jnp.tanh(g[:, 2 * H:3 * H])
            o = jax.nn.sigmoid(g[:, 3 * H:])
            c = f * c + i * gg
            h = o * jnp.tanh(c)
            return (h, c), None

        (h, _), _ = jax.lax.scan(
            cell,
            (jnp.zeros((B, H), jnp.float32), jnp.zeros((B, H), jnp.float32)),
            xs)
        return h

    h_f = run_dir(x, "")
    h_b = run_dir(x[::-1], "_reverse")
    hc = jnp.concatenate([h_f, h_b], axis=1)
    mu = hc @ params["fc_mu_w"].T + params["fc_mu_b"]
    sh = hc @ params["fc_sigma_w"].T + params["fc_sigma_b"]
    z = mu + jnp.exp(sh / 2.0) * noise
    return z, mu, sh


def init_params(key, H, Nz, input_size=5):
    keys = jax.random.split(key, 12)
    bound = 1.0 / jnp.sqrt(jnp.float32(H))

    def u(k, shape):
        return jax.random.uniform(k, shape, jnp.float32, -bound, bound)

    return {
        "wih_l0": u(keys[0], (4 * H, input_size)),
        "whh_l0": u(keys[1], (4 * H, H)),
        "bih_l0": u(keys[2], (4 * H,)),
        "bhh_l0": u(keys[3], (4 * H,)),
        "wih_l0_reverse": u(keys[4], (4 * H, input_size)),
        "whh_l0_reverse": u(keys[5], (4 * H, H)),
        "bih_l0_reverse": u(keys[6], (4 * H,)),
        "bhh_l0_reverse": u(keys[7], (4 * H,)),
        "fc_mu_w": u(keys[8], (Nz, 2 * H)),
        "fc_mu_b": u(keys[9], (Nz,)),
        "fc_sigma_w": u(keys[10], (Nz, 2 * H)),
        "fc_sigma_b": u(keys[11], (Nz,)),
    }


if __name__ == "__main__":
    # hp.enc_hidden_size = 32, hp.Nz = 16, seq = 8, batch = 2, input feature = 5
    T, B, H, Nz = 8, 2, 32, 16
    key = jax.random.PRNGKey(0)
    k_param, k_x, k_noise = jax.random.split(key, 3)

    params = init_params(k_param, H, Nz)
    x = jax.random.normal(k_x, (T, B, 5), jnp.float32)
    # TODO(synk): torch.randn_like uses the torch RNG stream; here the noise is
    # a deterministic JAX normal sample passed into the kernel.
    noise = jax.random.normal(k_noise, (B, Nz), jnp.float32)

    fused = fuse_params(params)   # one-time, parameter-load-time fusion
    z, mu, sigma_hat = jax.block_until_ready(encoder_rnn_forward(x, fused, noise))

    z_ref, mu_ref, sh_ref = encoder_rnn_reference(x, params, noise)
    assert z.shape == (B, Nz) and mu.shape == (B, Nz) and sigma_hat.shape == (B, Nz)
    assert jnp.allclose(mu, mu_ref, atol=2e-3, rtol=2e-3)
    assert jnp.allclose(sigma_hat, sh_ref, atol=2e-3, rtol=2e-3)
    assert jnp.allclose(z, z_ref, atol=2e-3, rtol=2e-3)

    print("KERNEL_OK")
</pallas_src>

<mosaic_0001>
module attributes {stable_mosaic.version = 11 : i64} {
  func.func @_encoder_kernel(%arg0: i32, %arg1: memref<64x5xf32, #tpu.memory_space<vmem>>, %arg2: memref<5x256xf32, #tpu.memory_space<vmem>>, %arg3: memref<1x256xf32, #tpu.memory_space<vmem>>, %arg4: memref<32x128xf32, #tpu.memory_space<vmem>>, %arg5: memref<32x128xf32, #tpu.memory_space<vmem>>, %arg6: memref<64x32xf32, #tpu.memory_space<vmem>>, %arg7: memref<1x32xf32, #tpu.memory_space<vmem>>, %arg8: memref<8x16xf32, #tpu.memory_space<vmem>>, %arg9: memref<8x128xf32, #tpu.memory_space<vmem>>, %arg10: memref<64x256xf32, #tpu.memory_space<vmem>>) attributes {dimension_semantics = [#tpu.dimension_semantics<arbitrary>], iteration_bounds = array<i64: 1>, scalar_prefetch = 0 : i64, scratch_operands = 1 : i64, tpu.core_type = #tpu.core_type<tc>, window_params = [{pipeline_mode = #tpu.pipeline_mode<synchronous>, transform_indices = @transform_0, window_bounds = array<i64: 64, 5>}, {pipeline_mode = #tpu.pipeline_mode<synchronous>, transform_indices = @transform_1, window_bounds = array<i64: 5, 256>}, {pipeline_mode = #tpu.pipeline_mode<synchronous>, transform_indices = @transform_2, window_bounds = array<i64: 1, 256>}, {pipeline_mode = #tpu.pipeline_mode<synchronous>, transform_indices = @transform_3, window_bounds = array<i64: 32, 128>}, {pipeline_mode = #tpu.pipeline_mode<synchronous>, transform_indices = @transform_4, window_bounds = array<i64: 32, 128>}, {pipeline_mode = #tpu.pipeline_mode<synchronous>, transform_indices = @transform_5, window_bounds = array<i64: 64, 32>}, {pipeline_mode = #tpu.pipeline_mode<synchronous>, transform_indices = @transform_6, window_bounds = array<i64: 1, 32>}, {pipeline_mode = #tpu.pipeline_mode<synchronous>, transform_indices = @transform_7, window_bounds = array<i64: 8, 16>}, {pipeline_mode = #tpu.pipeline_mode<synchronous>, transform_indices = @transform_8, window_bounds = array<i64: 8, 128>}]} {
    %c0 = arith.constant 0 : index
    %c0_0 = arith.constant 0 : index
    %0 = vector.load %arg1[%c0, %c0_0] : memref<64x5xf32, #tpu.memory_space<vmem>>, vector<64x5xf32>
    %c0_1 = arith.constant 0 : index
    %c0_2 = arith.constant 0 : index
    %1 = vector.load %arg2[%c0_1, %c0_2] : memref<5x256xf32, #tpu.memory_space<vmem>>, vector<5x256xf32>
    %cst = arith.constant dense<0.000000e+00> : vector<64x256xf32>
    %2 = tpu.matmul %0, %1, %cst {dimension_numbers = #tpu.dot_dimension_numbers<[1], [0], [0], [1], [0, 0, 1, 1], [], []>} : vector<64x5xf32>, vector<5x256xf32>, vector<64x256xf32> -> vector<64x256xf32>
    %c0_3 = arith.constant 0 : index
    %c0_4 = arith.constant 0 : index
    %3 = vector.load %arg3[%c0_3, %c0_4] : memref<1x256xf32, #tpu.memory_space<vmem>>, vector<1x256xf32>
    %4 = vector.broadcast %3 : vector<1x256xf32> to vector<64x256xf32>
    %5 = arith.addf %2, %4 : vector<64x256xf32>
    %c0_5 = arith.constant 0 : index
    %c0_6 = arith.constant 0 : index
    %6 = vector.load %arg10[%c0_5, %c0_6] : memref<64x256xf32, #tpu.memory_space<vmem>>, vector<64x256xf32>
    tpu.vector_store %arg10[%c0_5, %c0_6], %5 {strides = array<i32>} : memref<64x256xf32, #tpu.memory_space<vmem>>, vector<64x256xf32>,
    %c0_7 = arith.constant 0 : index
    %c0_8 = arith.constant 0 : index
    %7 = vector.load %arg4[%c0_7, %c0_8] : memref<32x128xf32, #tpu.memory_space<vmem>>, vector<32x128xf32>
    %c0_9 = arith.constant 0 : index
    %c0_10 = arith.constant 0 : index
    %8 = vector.load %arg5[%c0_9, %c0_10] : memref<32x128xf32, #tpu.memory_space<vmem>>, vector<32x128xf32>
    %cst_11 = arith.constant 0.000000e+00 : f32
    %9 = vector.broadcast %cst_11 : f32 to vector<8x32xf32>
    %c0_12 = arith.constant 0 : index
    %c0_13 = arith.constant 0 : index
    %10 = vector.load %arg10[%c0_12, %c0_13] : memref<64x256xf32, #tpu.memory_space<vmem>>, vector<8x128xf32>
    %c56 = arith.constant 56 : index
    %c128 = arith.constant 128 : index
    %11 = vector.load %arg10[%c56, %c128] : memref<64x256xf32, #tpu.memory_space<vmem>>, vector<8x128xf32>
    %cst_14 = arith.constant dense<0.000000e+00> : vector<8x128xf32>
    %12 = tpu.matmul %9, %7, %cst_14 {dimension_numbers = #tpu.dot_dimension_numbers<[1], [0], [0], [1], [0, 0, 1, 1], [], []>} : vector<8x32xf32>, vector<32x128xf32>, vector<8x128xf32> -> vector<8x128xf32>
    %13 = arith.addf %10, %12 : vector<8x128xf32>
    %14 = arith.negf %13 : vector<8x128xf32>
    %15 = math.exp %14 : vector<8x128xf32>
    %cst_15 = arith.constant 1.000000e+00 : f32
    %16 = vector.broadcast %cst_15 : f32 to vector<8x128xf32>
    %17 = arith.addf %16, %15 : vector<8x128xf32>
    %18 = arith.divf %16, %17 : vector<8x128xf32>
    %19 = vector.extract_strided_slice %18 {offsets = [0, 0], sizes = [8, 32], strides = [1, 1]} : vector<8x128xf32> to vector<8x32xf32>
    %20 = vector.extract_strided_slice %18 {offsets = [0, 32], sizes = [8, 32], strides = [1, 1]} : vector<8x128xf32> to vector<8x32xf32>
    %21 = vector.extract_strided_slice %18 {offsets = [0, 64], sizes = [8, 32], strides = [1, 1]} : vector<8x128xf32> to vector<8x32xf32>
    %22 = vector.extract_strided_slice %13 {offsets = [0, 96], sizes = [8, 32], strides = [1, 1]} : vector<8x128xf32> to vector<8x32xf32>
    %23 = math.tanh %22 : vector<8x32xf32>
    %24 = arith.mulf %20, %9 : vector<8x32xf32>
    %25 = arith.mulf %19, %23 : vector<8x32xf32>
    %26 = arith.addf %24, %25 : vector<8x32xf32>
    %27 = math.tanh %26 : vector<8x32xf32>
    %28 = arith.mulf %21, %27 : vector<8x32xf32>
    %cst_16 = arith.constant dense<0.000000e+00> : vector<8x128xf32>
    %29 = tpu.matmul %9, %8, %cst_16 {dimension_numbers = #tpu.dot_dimension_numbers<[1], [0], [0], [1], [0, 0, 1, 1], [], []>} : vector<8x32xf32>, vector<32x128xf32>, vector<8x128xf32> -> vector<8x128xf32>
    %30 = arith.addf %11, %29 : vector<8x128xf32>
    %31 = arith.negf %30 : vector<8x128xf32>
    %32 = math.exp %31 : vector<8x128xf32>
    %cst_17 = arith.constant 1.000000e+00 : f32
    %33 = vector.broadcast %cst_17 : f32 to vector<8x128xf32>
    %34 = arith.addf %33, %32 : vector<8x128xf32>
    %35 = arith.divf %33, %34 : vector<8x128xf32>
    %36 = vector.extract_strided_slice %35 {offsets = [0, 0], sizes = [8, 32], strides = [1, 1]} : vector<8x128xf32> to vector<8x32xf32>
    %37 = vector.extract_strided_slice %35 {offsets = [0, 32], sizes = [8, 32], strides = [1, 1]} : vector<8x128xf32> to vector<8x32xf32>
    %38 = vector.extract_strided_slice %35 {offsets = [0, 64], sizes = [8, 32], strides = [1, 1]} : vector<8x128xf32> to vector<8x32xf32>
    %39 = vector.extract_strided_slice %30 {offsets = [0, 96], sizes = [8, 32], strides = [1, 1]} : vector<8x128xf32> to vector<8x32xf32>
    %40 = math.tanh %39 : vector<8x32xf32>
    %41 = arith.mulf %37, %9 : vector<8x32xf32>
    %42 = arith.mulf %36, %40 : vector<8x32xf32>
    %43 = arith.addf %41, %42 : vector<8x32xf32>
    %44 = math.tanh %43 : vector<8x32xf32>
    %45 = arith.mulf %38, %44 : vector<8x32xf32>
    %c8 = arith.constant 8 : index
    %c0_18 = arith.constant 0 : index
    %46 = vector.load %arg10[%c8, %c0_18] : memref<64x256xf32, #tpu.memory_space<vmem>>, vector<8x128xf32>
    %c48 = arith.constant 48 : index
    %c128_19 = arith.constant 128 : index
    %47 = vector.load %arg10[%c48, %c128_19] : memref<64x256xf32, #tpu.memory_space<vmem>>, vector<8x128xf32>
    %cst_20 = arith.constant dense<0.000000e+00> : vector<8x128xf32>
    %48 = tpu.matmul %28, %7, %cst_20 {dimension_numbers = #tpu.dot_dimension_numbers<[1], [0], [0], [1], [0, 0, 1, 1], [], []>} : vector<8x32xf32>, vector<32x128xf32>, vector<8x128xf32> -> vector<8x128xf32>
    %49 = arith.addf %46, %48 : vector<8x128xf32>
    %50 = arith.negf %49 : vector<8x128xf32>
    %51 = math.exp %50 : vector<8x128xf32>
    %cst_21 = arith.constant 1.000000e+00 : f32
    %52 = vector.broadcast %cst_21 : f32 to vector<8x128xf32>
    %53 = arith.addf %52, %51 : vector<8x128xf32>
    %54 = arith.divf %52, %53 : vector<8x128xf32>
    %55 = vector.extract_strided_slice %54 {offsets = [0, 0], sizes = [8, 32], strides = [1, 1]} : vector<8x128xf32> to vector<8x32xf32>
    %56 = vector.extract_strided_slice %54 {offsets = [0, 32], sizes = [8, 32], strides = [1, 1]} : vector<8x128xf32> to vector<8x32xf32>
    %57 = vector.extract_strided_slice %54 {offsets = [0, 64], sizes = [8, 32], strides = [1, 1]} : vector<8x128xf32> to vector<8x32xf32>
    %58 = vector.extract_strided_slice %49 {offsets = [0, 96], sizes = [8, 32], strides = [1, 1]} : vector<8x128xf32> to vector<8x32xf32>
    %59 = math.tanh %58 : vector<8x32xf32>
    %60 = arith.mulf %56, %26 : vector<8x32xf32>
    %61 = arith.mulf %55, %59 : vector<8x32xf32>
    %62 = arith.addf %60, %61 : vector<8x32xf32>
    %63 = math.tanh %62 : vector<8x32xf32>
    %64 = arith.mulf %57, %63 : vector<8x32xf32>
    %cst_22 = arith.constant dense<0.000000e+00> : vector<8x128xf32>
    %65 = tpu.matmul %45, %8, %cst_22 {dimension_numbers = #tpu.dot_dimension_numbers<[1], [0], [0], [1], [0, 0, 1, 1], [], []>} : vector<8x32xf32>, vector<32x128xf32>, vector<8x128xf32> -> vector<8x128xf32>
    %66 = arith.addf %47, %65 : vector<8x128xf32>
    %67 = arith.negf %66 : vector<8x128xf32>
    %68 = math.exp %67 : vector<8x128xf32>
    %cst_23 = arith.constant 1.000000e+00 : f32
    %69 = vector.broadcast %cst_23 : f32 to vector<8x128xf32>
    %70 = arith.addf %69, %68 : vector<8x128xf32>
    %71 = arith.divf %69, %70 : vector<8x128xf32>
    %72 = vector.extract_strided_slice %71 {offsets = [0, 0], sizes = [8, 32], strides = [1, 1]} : vector<8x128xf32> to vector<8x32xf32>
    %73 = vector.extract_strided_slice %71 {offsets = [0, 32], sizes = [8, 32], strides = [1, 1]} : vector<8x128xf32> to vector<8x32xf32>
    %74 = vector.extract_strided_slice %71 {offsets = [0, 64], sizes = [8, 32], strides = [1, 1]} : vector<8x128xf32> to vector<8x32xf32>
    %75 = vector.extract_strided_slice %66 {offsets = [0, 96], sizes = [8, 32], strides = [1, 1]} : vector<8x128xf32> to vector<8x32xf32>
    %76 = math.tanh %75 : vector<8x32xf32>
    %77 = arith.mulf %73, %43 : vector<8x32xf32>
    %78 = arith.mulf %72, %76 : vector<8x32xf32>
    %79 = arith.addf %77, %78 : vector<8x32xf32>
    %80 = math.tanh %79 : vector<8x32xf32>
    %81 = arith.mulf %74, %80 : vector<8x32xf32>
    %c16 = arith.constant 16 : index
    %c0_24 = arith.constant 0 : index
    %82 = vector.load %arg10[%c16, %c0_24] : memref<64x256xf32, #tpu.memory_space<vmem>>, vector<8x128xf32>
    %c40 = arith.constant 40 : index
    %c128_25 = arith.constant 128 : index
    %83 = vector.load %arg10[%c40, %c128_25] : memref<64x256xf32, #tpu.memory_space<vmem>>, vector<8x128xf32>
    %cst_26 = arith.constant dense<0.000000e+00> : vector<8x128xf32>
    %84 = tpu.matmul %64, %7, %cst_26 {dimension_numbers = #tpu.dot_dimension_numbers<[1], [0], [0], [1], [0, 0, 1, 1], [], []>} : vector<8x32xf32>, vector<32x128xf32>, vector<8x128xf32> -> vector<8x128xf32>
    %85 = arith.addf %82, %84 : vector<8x128xf32>
    %86 = arith.negf %85 : vector<8x128xf32>
    %87 = math.exp %86 : vector<8x128xf32>
    %cst_27 = arith.constant 1.000000e+00 : f32
    %88 = vector.broadcast %cst_27 : f32 to vector<8x128xf32>
    %89 = arith.addf %88, %87 : vector<8x128xf32>
    %90 = arith.divf %88, %89 : vector<8x128xf32>
    %91 = vector.extract_strided_slice %90 {offsets = [0, 0], sizes = [8, 32], strides = [1, 1]} : vector<8x128xf32> to vector<8x32xf32>
    %92 = vector.extract_strided_slice %90 {offsets = [0, 32], sizes = [8, 32], strides = [1, 1]} : vector<8x128xf32> to vector<8x32xf32>
    %93 = vector.extract_strided_slice %90 {offsets = [0, 64], sizes = [8, 32], strides = [1, 1]} : vector<8x128xf32> to vector<8x32xf32>
    %94 = vector.extract_strided_slice %85 {offsets = [0, 96], sizes = [8, 32], strides = [1, 1]} : vector<8x128xf32> to vector<8x32xf32>
    %95 = math.tanh %94 : vector<8x32xf32>
    %96 = arith.mulf %92, %62 : vector<8x32xf32>
    %97 = arith.mulf %91, %95 : vector<8x32xf32>
    %98 = arith.addf %96, %97 : vector<8x32xf32>
    %99 = math.tanh %98 : vector<8x32xf32>
    %100 = arith.mulf %93, %99 : vector<8x32xf32>
    %cst_28 = arith.constant dense<0.000000e+00> : vector<8x128xf32>
    %101 = tpu.matmul %81, %8, %cst_28 {dimension_numbers = #tpu.dot_dimension_numbers<[1], [0], [0], [1], [0, 0, 1, 1], [], []>} : vector<8x32xf32>, vector<32x128xf32>, vector<8x128xf32> -> vector<8x128xf32>
    %102 = arith.addf %83, %101 : vector<8x128xf32>
    %103 = arith.negf %102 : vector<8x128xf32>
    %104 = math.exp %103 : vector<8x128xf32>
    %cst_29 = arith.constant 1.000000e+00 : f32
    %105 = vector.broadcast %cst_29 : f32 to vector<8x128xf32>
    %106 = arith.addf %105, %104 : vector<8x128xf32>
    %107 = arith.divf %105, %106 : vector<8x128xf32>
    %108 = vector.extract_strided_slice %107 {offsets = [0, 0], sizes = [8, 32], strides = [1, 1]} : vector<8x128xf32> to vector<8x32xf32>
    %109 = vector.extract_strided_slice %107 {offsets = [0, 32], sizes = [8, 32], strides = [1, 1]} : vector<8x128xf32> to vector<8x32xf32>
    %110 = vector.extract_strided_slice %107 {offsets = [0, 64], sizes = [8, 32], strides = [1, 1]} : vector<8x128xf32> to vector<8x32xf32>
    %111 = vector.extract_strided_slice %102 {offsets = [0, 96], sizes = [8, 32], strides = [1, 1]} : vector<8x128xf32> to vector<8x32xf32>
    %112 = math.tanh %111 : vector<8x32xf32>
    %113 = arith.mulf %109, %79 : vector<8x32xf32>
    %114 = arith.mulf %108, %112 : vector<8x32xf32>
    %115 = arith.addf %113, %114 : vector<8x32xf32>
    %116 = math.tanh %115 : vector<8x32xf32>
    %117 = arith.mulf %110, %116 : vector<8x32xf32>
    %c24 = arith.constant 24 : index
    %c0_30 = arith.constant 0 : index
    %118 = vector.load %arg10[%c24, %c0_30] : memref<64x256xf32, #tpu.memory_space<vmem>>, vector<8x128xf32>
    %c32 = arith.constant 32 : index
    %c128_31 = arith.constant 128 : index
    %119 = vector.load %arg10[%c32, %c128_31] : memref<64x256xf32, #tpu.memory_space<vmem>>, vector<8x128xf32>
    %cst_32 = arith.constant dense<0.000000e+00> : vector<8x128xf32>
    %120 = tpu.matmul %100, %7, %cst_32 {dimension_numbers = #tpu.dot_dimension_numbers<[1], [0], [0], [1], [0, 0, 1, 1], [], []>} : vector<8x32xf32>, vector<32x128xf32>, vector<8x128xf32> -> vector<8x128xf32>
    %121 = arith.addf %118, %120 : vector<8x128xf32>
    %122 = arith.negf %121 : vector<8x128xf32>
    %123 = math.exp %122 : vector<8x128xf32>
    %cst_33 = arith.constant 1.000000e+00 : f32
    %124 = vector.broadcast %cst_33 : f32 to vector<8x128xf32>
    %125 = arith.addf %124, %123 : vector<8x128xf32>
    %126 = arith.divf %124, %125 : vector<8x128xf32>
    %127 = vector.extract_strided_slice %126 {offsets = [0, 0], sizes = [8, 32], strides = [1, 1]} : vector<8x128xf32> to vector<8x32xf32>
    %128 = vector.extract_strided_slice %126 {offsets = [0, 32], sizes = [8, 32], strides = [1, 1]} : vector<8x128xf32> to vector<8x32xf32>
    %129 = vector.extract_strided_slice %126 {offsets = [0, 64], sizes = [8, 32], strides = [1, 1]} : vector<8x128xf32> to vector<8x32xf32>
    %130 = vector.extract_strided_slice %121 {offsets = [0, 96], sizes = [8, 32], strides = [1, 1]} : vector<8x128xf32> to vector<8x32xf32>
    %131 = math.tanh %130 : vector<8x32xf32>
    %132 = arith.mulf %128, %98 : vector<8x32xf32>
    %133 = arith.mulf %127, %131 : vector<8x32xf32>
    %134 = arith.addf %132, %133 : vector<8x32xf32>
    %135 = math.tanh %134 : vector<8x32xf32>
    %136 = arith.mulf %129, %135 : vector<8x32xf32>
    %cst_34 = arith.constant dense<0.000000e+00> : vector<8x128xf32>
    %137 = tpu.matmul %117, %8, %cst_34 {dimension_numbers = #tpu.dot_dimension_numbers<[1], [0], [0], [1], [0, 0, 1, 1], [], []>} : vector<8x32xf32>, vector<32x128xf32>, vector<8x128xf32> -> vector<8x128xf32>
    %138 = arith.addf %119, %137 : vector<8x128xf32>
    %139 = arith.negf %138 : vector<8x128xf32>
    %140 = math.exp %139 : vector<8x128xf32>
    %cst_35 = arith.constant 1.000000e+00 : f32
    %141 = vector.broadcast %cst_35 : f32 to vector<8x128xf32>
    %142 = arith.addf %141, %140 : vector<8x128xf32>
    %143 = arith.divf %141, %142 : vector<8x128xf32>
    %144 = vector.extract_strided_slice %143 {offsets = [0, 0], sizes = [8, 32], strides = [1, 1]} : vector<8x128xf32> to vector<8x32xf32>
    %145 = vector.extract_strided_slice %143 {offsets = [0, 32], sizes = [8, 32], strides = [1, 1]} : vector<8x128xf32> to vector<8x32xf32>
    %146 = vector.extract_strided_slice %143 {offsets = [0, 64], sizes = [8, 32], strides = [1, 1]} : vector<8x128xf32> to vector<8x32xf32>
    %147 = vector.extract_strided_slice %138 {offsets = [0, 96], sizes = [8, 32], strides = [1, 1]} : vector<8x128xf32> to vector<8x32xf32>
    %148 = math.tanh %147 : vector<8x32xf32>
    %149 = arith.mulf %145, %115 : vector<8x32xf32>
    %150 = arith.mulf %144, %148 : vector<8x32xf32>
    %151 = arith.addf %149, %150 : vector<8x32xf32>
    %152 = math.tanh %151 : vector<8x32xf32>
    %153 = arith.mulf %146, %152 : vector<8x32xf32>
    %c32_36 = arith.constant 32 : index
    %c0_37 = arith.constant 0 : index
    %154 = vector.load %arg10[%c32_36, %c0_37] : memref<64x256xf32, #tpu.memory_space<vmem>>, vector<8x128xf32>
    %c24_38 = arith.constant 24 : index
    %c128_39 = arith.constant 128 : index
    %155 = vector.load %arg10[%c24_38, %c128_39] : memref<64x256xf32, #tpu.memory_space<vmem>>, vector<8x128xf32>
    %cst_40 = arith.constant dense<0.000000e+00> : vector<8x128xf32>
    %156 = tpu.matmul %136, %7, %cst_40 {dimension_numbers = #tpu.dot_dimension_numbers<[1], [0], [0], [1], [0, 0, 1, 1], [], []>} : vector<8x32xf32>, vector<32x128xf32>, vector<8x128xf32> -> vector<8x128xf32>
    %157 = arith.addf %154, %156 : vector<8x128xf32>
    %158 = arith.negf %157 : vector<8x128xf32>
    %159 = math.exp %158 : vector<8x128xf32>
    %cst_41 = arith.constant 1.000000e+00 : f32
    %160 = vector.broadcast %cst_41 : f32 to vector<8x128xf32>
    %161 = arith.addf %160, %159 : vector<8x128xf32>
    %162 = arith.divf %160, %161 : vector<8x128xf32>
    %163 = vector.extract_strided_slice %162 {offsets = [0, 0], sizes = [8, 32], strides = [1, 1]} : vector<8x128xf32> to vector<8x32xf32>
    %164 = vector.extract_strided_slice %162 {offsets = [0, 32], sizes = [8, 32], strides = [1, 1]} : vector<8x128xf32> to vector<8x32xf32>
    %165 = vector.extract_strided_slice %162 {offsets = [0, 64], sizes = [8, 32], strides = [1, 1]} : vector<8x128xf32> to vector<8x32xf32>
    %166 = vector.extract_strided_slice %157 {offsets = [0, 96], sizes = [8, 32], strides = [1, 1]} : vector<8x128xf32> to vector<8x32xf32>
    %167 = math.tanh %166 : vector<8x32xf32>
    %168 = arith.mulf %164, %134 : vector<8x32xf32>
    %169 = arith.mulf %163, %167 : vector<8x32xf32>
    %170 = arith.addf %168, %169 : vector<8x32xf32>
    %171 = math.tanh %170 : vector<8x32xf32>
    %172 = arith.mulf %165, %171 : vector<8x32xf32>
    %cst_42 = arith.constant dense<0.000000e+00> : vector<8x128xf32>
    %173 = tpu.matmul %153, %8, %cst_42 {dimension_numbers = #tpu.dot_dimension_numbers<[1], [0], [0], [1], [0, 0, 1, 1], [], []>} : vector<8x32xf32>, vector<32x128xf32>, vector<8x128xf32> -> vector<8x128xf32>
    %174 = arith.addf %155, %173 : vector<8x128xf32>
    %175 = arith.negf %174 : vector<8x128xf32>
    %176 = math.exp %175 : vector<8x128xf32>
    %cst_43 = arith.constant 1.000000e+00 : f32
    %177 = vector.broadcast %cst_43 : f32 to vector<8x128xf32>
    %178 = arith.addf %177, %176 : vector<8x128xf32>
    %179 = arith.divf %177, %178 : vector<8x128xf32>
    %180 = vector.extract_strided_slice %179 {offsets = [0, 0], sizes = [8, 32], strides = [1, 1]} : vector<8x128xf32> to vector<8x32xf32>
    %181 = vector.extract_strided_slice %179 {offsets = [0, 32], sizes = [8, 32], strides = [1, 1]} : vector<8x128xf32> to vector<8x32xf32>
    %182 = vector.extract_strided_slice %179 {offsets = [0, 64], sizes = [8, 32], strides = [1, 1]} : vector<8x128xf32> to vector<8x32xf32>
    %183 = vector.extract_strided_slice %174 {offsets = [0, 96], sizes = [8, 32], strides = [1, 1]} : vector<8x128xf32> to vector<8x32xf32>
    %184 = math.tanh %183 : vector<8x32xf32>
    %185 = arith.mulf %181, %151 : vector<8x32xf32>
    %186 = arith.mulf %180, %184 : vector<8x32xf32>
    %187 = arith.addf %185, %186 : vector<8x32xf32>
    %188 = math.tanh %187 : vector<8x32xf32>
    %189 = arith.mulf %182, %188 : vector<8x32xf32>
    %c40_44 = arith.constant 40 : index
    %c0_45 = arith.constant 0 : index
    %190 = vector.load %arg10[%c40_44, %c0_45] : memref<64x256xf32, #tpu.memory_space<vmem>>, vector<8x128xf32>
    %c16_46 = arith.constant 16 : index
    %c128_47 = arith.constant 128 : index
    %191 = vector.load %arg10[%c16_46, %c128_47] : memref<64x256xf32, #tpu.memory_space<vmem>>, vector<8x128xf32>
    %cst_48 = arith.constant dense<0.000000e+00> : vector<8x128xf32>
    %192 = tpu.matmul %172, %7, %cst_48 {dimension_numbers = #tpu.dot_dimension_numbers<[1], [0], [0], [1], [0, 0, 1, 1], [], []>} : vector<8x32xf32>, vector<32x128xf32>, vector<8x128xf32> -> vector<8x128xf32>
    %193 = arith.addf %190, %192 : vector<8x128xf32>
    %194 = arith.negf %193 : vector<8x128xf32>
    %195 = math.exp %194 : vector<8x128xf32>
    %cst_49 = arith.constant 1.000000e+00 : f32
    %196 = vector.broadcast %cst_49 : f32 to vector<8x128xf32>
    %197 = arith.addf %196, %195 : vector<8x128xf32>
    %198 = arith.divf %196, %197 : vector<8x128xf32>
    %199 = vector.extract_strided_slice %198 {offsets = [0, 0], sizes = [8, 32], strides = [1, 1]} : vector<8x128xf32> to vector<8x32xf32>
    %200 = vector.extract_strided_slice %198 {offsets = [0, 32], sizes = [8, 32], strides = [1, 1]} : vector<8x128xf32> to vector<8x32xf32>
    %201 = vector.extract_strided_slice %198 {offsets = [0, 64], sizes = [8, 32], strides = [1, 1]} : vector<8x128xf32> to vector<8x32xf32>
    %202 = vector.extract_strided_slice %193 {offsets = [0, 96], sizes = [8, 32], strides = [1, 1]} : vector<8x128xf32> to vector<8x32xf32>
    %203 = math.tanh %202 : vector<8x32xf32>
    %204 = arith.mulf %200, %170 : vector<8x32xf32>
    %205 = arith.mulf %199, %203 : vector<8x32xf32>
    %206 = arith.addf %204, %205 : vector<8x32xf32>
    %207 = math.tanh %206 : vector<8x32xf32>
    %208 = arith.mulf %201, %207 : vector<8x32xf32>
    %cst_50 = arith.constant dense<0.000000e+00> : vector<8x128xf32>
    %209 = tpu.matmul %189, %8, %cst_50 {dimension_numbers = #tpu.dot_dimension_numbers<[1], [0], [0], [1], [0, 0, 1, 1], [], []>} : vector<8x32xf32>, vector<32x128xf32>, vector<8x128xf32> -> vector<8x128xf32>
    %210 = arith.addf %191, %209 : vector<8x128xf32>
    %211 = arith.negf %210 : vector<8x128xf32>
    %212 = math.exp %211 : vector<8x128xf32>
    %cst_51 = arith.constant 1.000000e+00 : f32
    %213 = vector.broadcast %cst_51 : f32 to vector<8x128xf32>
    %214 = arith.addf %213, %212 : vector<8x128xf32>
    %215 = arith.divf %213, %214 : vector<8x128xf32>
    %216 = vector.extract_strided_slice %215 {offsets = [0, 0], sizes = [8, 32], strides = [1, 1]} : vector<8x128xf32> to vector<8x32xf32>
    %217 = vector.extract_strided_slice %215 {offsets = [0, 32], sizes = [8, 32], strides = [1, 1]} : vector<8x128xf32> to vector<8x32xf32>
    %218 = vector.extract_strided_slice %215 {offsets = [0, 64], sizes = [8, 32], strides = [1, 1]} : vector<8x128xf32> to vector<8x32xf32>
    %219 = vector.extract_strided_slice %210 {offsets = [0, 96], sizes = [8, 32], strides = [1, 1]} : vector<8x128xf32> to vector<8x32xf32>
    %220 = math.tanh %219 : vector<8x32xf32>
    %221 = arith.mulf %217, %187 : vector<8x32xf32>
    %222 = arith.mulf %216, %220 : vector<8x32xf32>
    %223 = arith.addf %221, %222 : vector<8x32xf32>
    %224 = math.tanh %223 : vector<8x32xf32>
    %225 = arith.mulf %218, %224 : vector<8x32xf32>
    %c48_52 = arith.constant 48 : index
    %c0_53 = arith.constant 0 : index
    %226 = vector.load %arg10[%c48_52, %c0_53] : memref<64x256xf32, #tpu.memory_space<vmem>>, vector<8x128xf32>
    %c8_54 = arith.constant 8 : index
    %c128_55 = arith.constant 128 : index
    %227 = vector.load %arg10[%c8_54, %c128_55] : memref<64x256xf32, #tpu.memory_space<vmem>>, vector<8x128xf32>
    %cst_56 = arith.constant dense<0.000000e+00> : vector<8x128xf32>
    %228 = tpu.matmul %208, %7, %cst_56 {dimension_numbers = #tpu.dot_dimension_numbers<[1], [0], [0], [1], [0, 0, 1, 1], [], []>} : vector<8x32xf32>, vector<32x128xf32>, vector<8x128xf32> -> vector<8x128xf32>
    %229 = arith.addf %226, %228 : vector<8x128xf32>
    %230 = arith.negf %229 : vector<8x128xf32>
    %231 = math.exp %230 : vector<8x128xf32>
    %cst_57 = arith.constant 1.000000e+00 : f32
    %232 = vector.broadcast %cst_57 : f32 to vector<8x128xf32>
    %233 = arith.addf %232, %231 : vector<8x128xf32>
    %234 = arith.divf %232, %233 : vector<8x128xf32>
    %235 = vector.extract_strided_slice %234 {offsets = [0, 0], sizes = [8, 32], strides = [1, 1]} : vector<8x128xf32> to vector<8x32xf32>
    %236 = vector.extract_strided_slice %234 {offsets = [0, 32], sizes = [8, 32], strides = [1, 1]} : vector<8x128xf32> to vector<8x32xf32>
    %237 = vector.extract_strided_slice %234 {offsets = [0, 64], sizes = [8, 32], strides = [1, 1]} : vector<8x128xf32> to vector<8x32xf32>
    %238 = vector.extract_strided_slice %229 {offsets = [0, 96], sizes = [8, 32], strides = [1, 1]} : vector<8x128xf32> to vector<8x32xf32>
    %239 = math.tanh %238 : vector<8x32xf32>
    %240 = arith.mulf %236, %206 : vector<8x32xf32>
    %241 = arith.mulf %235, %239 : vector<8x32xf32>
    %242 = arith.addf %240, %241 : vector<8x32xf32>
    %243 = math.tanh %242 : vector<8x32xf32>
    %244 = arith.mulf %237, %243 : vector<8x32xf32>
    %cst_58 = arith.constant dense<0.000000e+00> : vector<8x128xf32>
    %245 = tpu.matmul %225, %8, %cst_58 {dimension_numbers = #tpu.dot_dimension_numbers<[1], [0], [0], [1], [0, 0, 1, 1], [], []>} : vector<8x32xf32>, vector<32x128xf32>, vector<8x128xf32> -> vector<8x128xf32>
    %246 = arith.addf %227, %245 : vector<8x128xf32>
    %247 = arith.negf %246 : vector<8x128xf32>
    %248 = math.exp %247 : vector<8x128xf32>
    %cst_59 = arith.constant 1.000000e+00 : f32
    %249 = vector.broadcast %cst_59 : f32 to vector<8x128xf32>
    %250 = arith.addf %249, %248 : vector<8x128xf32>
    %251 = arith.divf %249, %250 : vector<8x128xf32>
    %252 = vector.extract_strided_slice %251 {offsets = [0, 0], sizes = [8, 32], strides = [1, 1]} : vector<8x128xf32> to vector<8x32xf32>
    %253 = vector.extract_strided_slice %251 {offsets = [0, 32], sizes = [8, 32], strides = [1, 1]} : vector<8x128xf32> to vector<8x32xf32>
    %254 = vector.extract_strided_slice %251 {offsets = [0, 64], sizes = [8, 32], strides = [1, 1]} : vector<8x128xf32> to vector<8x32xf32>
    %255 = vector.extract_strided_slice %246 {offsets = [0, 96], sizes = [8, 32], strides = [1, 1]} : vector<8x128xf32> to vector<8x32xf32>
    %256 = math.tanh %255 : vector<8x32xf32>
    %257 = arith.mulf %253, %223 : vector<8x32xf32>
    %258 = arith.mulf %252, %256 : vector<8x32xf32>
    %259 = arith.addf %257, %258 : vector<8x32xf32>
    %260 = math.tanh %259 : vector<8x32xf32>
    %261 = arith.mulf %254, %260 : vector<8x32xf32>
    %c56_60 = arith.constant 56 : index
    %c0_61 = arith.constant 0 : index
    %262 = vector.load %arg10[%c56_60, %c0_61] : memref<64x256xf32, #tpu.memory_space<vmem>>, vector<8x128xf32>
    %c0_62 = arith.constant 0 : index
    %c128_63 = arith.constant 128 : index
    %263 = vector.load %arg10[%c0_62, %c128_63] : memref<64x256xf32, #tpu.memory_space<vmem>>, vector<8x128xf32>
    %cst_64 = arith.constant dense<0.000000e+00> : vector<8x128xf32>
    %264 = tpu.matmul %244, %7, %cst_64 {dimension_numbers = #tpu.dot_dimension_numbers<[1], [0], [0], [1], [0, 0, 1, 1], [], []>} : vector<8x32xf32>, vector<32x128xf32>, vector<8x128xf32> -> vector<8x128xf32>
    %265 = arith.addf %262, %264 : vector<8x128xf32>
    %266 = arith.negf %265 : vector<8x128xf32>
    %267 = math.exp %266 : vector<8x128xf32>
    %cst_65 = arith.constant 1.000000e+00 : f32
    %268 = vector.broadcast %cst_65 : f32 to vector<8x128xf32>
    %269 = arith.addf %268, %267 : vector<8x128xf32>
    %270 = arith.divf %268, %269 : vector<8x128xf32>
    %271 = vector.extract_strided_slice %270 {offsets = [0, 0], sizes = [8, 32], strides = [1, 1]} : vector<8x128xf32> to vector<8x32xf32>
    %272 = vector.extract_strided_slice %270 {offsets = [0, 32], sizes = [8, 32], strides = [1, 1]} : vector<8x128xf32> to vector<8x32xf32>
    %273 = vector.extract_strided_slice %270 {offsets = [0, 64], sizes = [8, 32], strides = [1, 1]} : vector<8x128xf32> to vector<8x32xf32>
    %274 = vector.extract_strided_slice %265 {offsets = [0, 96], sizes = [8, 32], strides = [1, 1]} : vector<8x128xf32> to vector<8x32xf32>
    %275 = math.tanh %274 : vector<8x32xf32>
    %276 = arith.mulf %272, %242 : vector<8x32xf32>
    %277 = arith.mulf %271, %275 : vector<8x32xf32>
    %278 = arith.addf %276, %277 : vector<8x32xf32>
    %279 = math.tanh %278 : vector<8x32xf32>
    %280 = arith.mulf %273, %279 : vector<8x32xf32>
    %cst_66 = arith.constant dense<0.000000e+00> : vector<8x128xf32>
    %281 = tpu.matmul %261, %8, %cst_66 {dimension_numbers = #tpu.dot_dimension_numbers<[1], [0], [0], [1], [0, 0, 1, 1], [], []>} : vector<8x32xf32>, vector<32x128xf32>, vector<8x128xf32> -> vector<8x128xf32>
    %282 = arith.addf %263, %281 : vector<8x128xf32>
    %283 = arith.negf %282 : vector<8x128xf32>
    %284 = math.exp %283 : vector<8x128xf32>
    %cst_67 = arith.constant 1.000000e+00 : f32
    %285 = vector.broadcast %cst_67 : f32 to vector<8x128xf32>
    %286 = arith.addf %285, %284 : vector<8x128xf32>
    %287 = arith.divf %285, %286 : vector<8x128xf32>
    %288 = vector.extract_strided_slice %287 {offsets = [0, 0], sizes = [8, 32], strides = [1, 1]} : vector<8x128xf32> to vector<8x32xf32>
    %289 = vector.extract_strided_slice %287 {offsets = [0, 32], sizes = [8, 32], strides = [1, 1]} : vector<8x128xf32> to vector<8x32xf32>
    %290 = vector.extract_strided_slice %287 {offsets = [0, 64], sizes = [8, 32], strides = [1, 1]} : vector<8x128xf32> to vector<8x32xf32>
    %291 = vector.extract_strided_slice %282 {offsets = [0, 96], sizes = [8, 32], strides = [1, 1]} : vector<8x128xf32> to vector<8x32xf32>
    %292 = math.tanh %291 : vector<8x32xf32>
    %293 = arith.mulf %289, %259 : vector<8x32xf32>
    %294 = arith.mulf %288, %292 : vector<8x32xf32>
    %295 = arith.addf %293, %294 : vector<8x32xf32>
    %296 = math.tanh %295 : vector<8x32xf32>
    %297 = arith.mulf %290, %296 : vector<8x32xf32>
    %298 = tpu.concatenate %280, %297 in 1 : vector<8x32xf32>, vector<8x32xf32> -> vector<8x64xf32>
    %c0_68 = arith.constant 0 : index
    %c0_69 = arith.constant 0 : index
    %299 = vector.load %arg6[%c0_68, %c0_69] : memref<64x32xf32, #tpu.memory_space<vmem>>, vector<64x32xf32>
    %cst_70 = arith.constant dense<0.000000e+00> : vector<8x32xf32>
    %300 = tpu.matmul %298, %299, %cst_70 {dimension_numbers = #tpu.dot_dimension_numbers<[1], [0], [0], [1], [0, 0, 1, 1], [], []>} : vector<8x64xf32>, vector<64x32xf32>, vector<8x32xf32> -> vector<8x32xf32>
    %c0_71 = arith.constant 0 : index
    %c0_72 = arith.constant 0 : index
    %301 = vector.load %arg7[%c0_71, %c0_72] : memref<1x32xf32, #tpu.memory_space<vmem>>, vector<1x32xf32>
    %302 = vector.broadcast %301 : vector<1x32xf32> to vector<8x32xf32>
    %303 = arith.addf %300, %302 : vector<8x32xf32>
    %304 = vector.extract_strided_slice %303 {offsets = [0, 0], sizes = [8, 16], strides = [1, 1]} : vector<8x32xf32> to vector<8x16xf32>
    %305 = vector.extract_strided_slice %303 {offsets = [0, 16], sizes = [8, 16], strides = [1, 1]} : vector<8x32xf32> to vector<8x16xf32>
    %cst_73 = arith.constant 5.000000e-01 : f32
    %306 = vector.broadcast %cst_73 : f32 to vector<8x16xf32>
    %307 = arith.mulf %305, %306 : vector<8x16xf32>
    %308 = math.exp %307 : vector<8x16xf32>
    %c0_74 = arith.constant 0 : index
    %c0_75 = arith.constant 0 : index
    %309 = vector.load %arg8[%c0_74, %c0_75] : memref<8x16xf32, #tpu.memory_space<vmem>>, vector<8x16xf32>
    %310 = arith.mulf %308, %309 : vector<8x16xf32>
    %311 = arith.addf %304, %310 : vector<8x16xf32>
    %cst_76 = arith.constant 0.000000e+00 : f32
    %312 = vector.broadcast %cst_76 : f32 to vector<8x80xf32>
    %313 = tpu.concatenate %311, %304, %305, %312 in 1 : vector<8x16xf32>, vector<8x16xf32>, vector<8x16xf32>, vector<8x80xf32> -> vector<8x128xf32>
    %c0_77 = arith.constant 0 : index
    %c0_78 = arith.constant 0 : index
    %314 = vector.load %arg9[%c0_77, %c0_78] : memref<8x128xf32, #tpu.memory_space<vmem>>, vector<8x128xf32>
    tpu.vector_store %arg9[%c0_77, %c0_78], %313 {strides = array<i32>} : memref<8x128xf32, #tpu.memory_space<vmem>>, vector<8x128xf32>,
    return
  }
  func.func @transform_0(%arg0: i32) -> (i32, i32) {
    %c0_i32 = arith.constant 0 : i32
    %c0_i32_0 = arith.constant 0 : i32
    %c0_i32_1 = arith.constant 0 : i32
    return %c0_i32, %c0_i32_0 : i32, i32
  }
  func.func @transform_1(%arg0: i32) -> (i32, i32) {
    %c0_i32 = arith.constant 0 : i32
    %c0_i32_0 = arith.constant 0 : i32
    %c0_i32_1 = arith.constant 0 : i32
    return %c0_i32, %c0_i32_0 : i32, i32
  }
  func.func @transform_2(%arg0: i32) -> (i32, i32) {
    %c0_i32 = arith.constant 0 : i32
    %c0_i32_0 = arith.constant 0 : i32
    %c0_i32_1 = arith.constant 0 : i32
    return %c0_i32, %c0_i32_0 : i32, i32
  }
  func.func @transform_3(%arg0: i32) -> (i32, i32) {
    %c0_i32 = arith.constant 0 : i32
    %c0_i32_0 = arith.constant 0 : i32
    %c0_i32_1 = arith.constant 0 : i32
    return %c0_i32, %c0_i32_0 : i32, i32
  }
  func.func @transform_4(%arg0: i32) -> (i32, i32) {
    %c0_i32 = arith.constant 0 : i32
    %c0_i32_0 = arith.constant 0 : i32
    %c0_i32_1 = arith.constant 0 : i32
    return %c0_i32, %c0_i32_0 : i32, i32
  }
  func.func @transform_5(%arg0: i32) -> (i32, i32) {
    %c0_i32 = arith.constant 0 : i32
    %c0_i32_0 = arith.constant 0 : i32
    %c0_i32_1 = arith.constant 0 : i32
    return %c0_i32, %c0_i32_0 : i32, i32
  }
  func.func @transform_6(%arg0: i32) -> (i32, i32) {
    %c0_i32 = arith.constant 0 : i32
    %c0_i32_0 = arith.constant 0 : i32
    %c0_i32_1 = arith.constant 0 : i32
    return %c0_i32, %c0_i32_0 : i32, i32
  }
  func.func @transform_7(%arg0: i32) -> (i32, i32) {
    %c0_i32 = arith.constant 0 : i32
    %c0_i32_0 = arith.constant 0 : i32
    %c0_i32_1 = arith.constant 0 : i32
    return %c0_i32, %c0_i32_0 : i32, i32
  }
  func.func @transform_8(%arg0: i32) -> (i32, i32) {
    %c0_i32 = arith.constant 0 : i32
    %c0_i32_0 = arith.constant 0 : i32
    %c0_i32_1 = arith.constant 0 : i32
    return %c0_i32, %c0_i32_0 : i32, i32
  }
}

</mosaic_0001>

<bundles_post_ra>
// kernel: tpu_custom_call.1
= control target key start
LH: loop header
LB: loop body
LE: loop exit
PB: predicated region body
PF: predicated region fallthrough
CT: control target
= control target key end

     0   :  { %vm71_vm0 = vcmask 1044480   ;;  %vm46_vm1 = vcmask 39936   ;;  %s1904_s0 = inlined_call_operand.vmem [shape: f32[64,5], index: 0, kind: input, shape index: {}]   ;;  %s1905_s1 = inlined_call_operand.vmem [shape: f32[5,256], index: 1, kind: input, shape index: {}]   ;;  %s1906_s2 = inlined_call_operand.vmem [shape: f32[1,256], index: 2, kind: input, shape index: {}]   ;;  %s1907_s3 = inlined_call_operand.vmem [shape: f32[32,128], index: 3, kind: input, shape index: {}]   ;;  %s1908_s4 = inlined_call_operand.vmem [shape: f32[32,128], index: 4, kind: input, shape index: {}]   ;;  %s1909_s5 = inlined_call_operand.vmem [shape: f32[64,32], index: 5, kind: input, shape index: {}]   ;;  %s1910_s6 = inlined_call_operand.vmem [shape: f32[1,32], index: 6, kind: input, shape index: {}]   ;;  %s1911_s7 = inlined_call_operand.vmem [shape: f32[8,16], index: 7, kind: input, shape index: {}]   ;;  %s1912_s8 = inlined_call_operand.hbm [shape: f32[8,128], index: 8, kind: output, shape index: {}]  }
   0x1   :  { %v39_v0 = vld [vmem:[%s1905_s1 + $0x8] sm:$0x1f]  ;;  %v1558_v1 = vld [vmem:[%s1907_s3 + $0x18] sm:$0xff]  ;;  %v30_v2 = vld [vmem:[%s1904_s0] sm:$0xff] }
   0x2   :  { %1296 = vmatpush.msk.msra.mxu1 %vm71_vm0, %v39_v0  ;;  %202 = vmatpush.msra.mxu2 %v1558_v1  ;;  %v1567_v3 = vld [vmem:[%s1907_s3 + $0x10] sm:$0xff]  ;;  %v1573_v4 = vld [vmem:[%s1907_s3 + $0x8] sm:$0xff]  ;;  %v38_v5 = vld [vmem:[%s1905_s1] sm:$0x1f] }
   0x3   :  { %1297 = vmatmul.msk.f32.vlgmr.msra.gmra.mxu1 %vm46_vm1, %v30_v2  ;;  %1287 = vmatpush.msk.msra.mxu0 %vm71_vm0, %v38_v5  ;;  %v1582_v6 = vld [vmem:[%s1907_s3] sm:$0xff] }
   0x4   :  { %203 = vmatpush.msra.mxu2 %v1567_v3  ;;  %1288 = vmatmul.msk.f32.vlgmr.msra.gmra.mxu0 %vm46_vm1, %v30_v2 }
   0x5   :  { %13 = vsyncpa [#allocation4], 0  ;;  %v31_v7 = vld [vmem:[%s1904_s0 + $0x8] sm:$0xff]  ;;  %v1500_v8 = vmov 0.0   ;;  %v1595_v9 = vld [vmem:[%s1908_s4 + $0x18] sm:$0xff]  ;;  %vm186_vm10 = vcmask 261120  }
   0x6   :  { %204 = vmatpush.msra.mxu2 %v1573_v4  ;;  %v1600_v10 = vld [vmem:[%s1908_s4 + $0x10] sm:$0xff]  ;;  %260 = vmatpush.msra.mxu3 %v1595_v9  ;;  %v1616_v12 = vld [vmem:[%s1908_s4 + $0x8] sm:$0xff]  ;;  %v1621_v13 = vld [vmem:[%s1908_s4] sm:$0xff]  ;;  %s1503_s18 = smov 96   ;;  %s1504_s12 = smov 16  }
   0x7   :  { %v32_v11 = vld [vmem:[%s1904_s0 + $0x10] sm:$0xff]  ;;  %v33_v14 = vld [vmem:[%s1904_s0 + $0x18] sm:$0xff]  ;;  %v34_v15 = vld [vmem:[%s1904_s0 + $0x20] sm:$0xff] }
   0x8   :  { %205 = vmatpush.msra.mxu2 %v1582_v6  ;;  %261 = vmatpush.msra.mxu3 %v1600_v10  ;;  %v35_v16 = vld [vmem:[%s1904_s0 + $0x28] sm:$0xff]  ;;  %v36_v17 = vld [vmem:[%s1904_s0 + $0x30] sm:$0xff]  ;;  %v37_v18 = vld [vmem:[%s1904_s0 + $0x38] sm:$0xff]  ;;  %s1501_s0 = smov 32  }
   0x9   :  { %206 = vmatmul.f32.vlgmr.msra.gmra.mxu2 %v1500_v8  ;;  %v40_v19 = vld [vmem:[%s1906_s2] sm:$0x3]  ;;  %s1502_s2 = smov 64  }
   0xa   :  { %325 = vmatpush.msrb.mxu2 %v1558_v1  ;;  %262 = vmatpush.msra.mxu3 %v1616_v12  ;;  %v43_v20 = vperm.slane %v40_v19, 1  ;;  %v1667_v23 = vperm.slane %v40_v19, 0 }
   0xb   :  { %1298 = vmatmul.msk.f32.gmra.mxu1 %vm46_vm1, %v31_v7 }
   0xc   :  { %326 = vmatpush.msrb.mxu2 %v1567_v3  ;;  %1289 = vmatmul.msk.f32.gmra.mxu0 %vm46_vm1, %v31_v7 }
   0xd   :  { %263 = vmatpush.msra.mxu3 %v1621_v13 }
   0xe   :  { %327 = vmatpush.msrb.mxu2 %v1573_v4  ;;  %264 = vmatmul.f32.vlgmr.msra.gmra.mxu3 %v1500_v8 }
   0xf   :  { %388 = vmatpush.msrb.mxu3 %v1595_v9 }
  0x10   :  { %328 = vmatpush.msrb.mxu2 %v1582_v6 }
  0x11   :  { %389 = vmatpush.msrb.mxu3 %v1600_v10 }
  0x12   :  { %453 = vmatpush.msra.mxu2 %v1558_v1 }
  0x13   :  { %1299 = vmatmul.msk.f32.gmra.mxu1 %vm46_vm1, %v32_v11  ;;  %390 = vmatpush.msrb.mxu3 %v1616_v12 }
  0x14   :  { %454 = vmatpush.msra.mxu2 %v1567_v3  ;;  %1290 = vmatmul.msk.f32.gmra.mxu0 %vm46_vm1, %v32_v11 }
  0x15   :  { %391 = vmatpush.msrb.mxu3 %v1621_v13 }
  0x16   :  { %455 = vmatpush.msra.mxu2 %v1573_v4 }
  0x17   :  { %516 = vmatpush.msra.mxu3 %v1595_v9 }
  0x18   :  { %456 = vmatpush.msra.mxu2 %v1582_v6 }
  0x19   :  { %517 = vmatpush.msra.mxu3 %v1600_v10 }
  0x1b   :  { %1300 = vmatmul.msk.f32.gmra.mxu1 %vm46_vm1, %v33_v14  ;;  %518 = vmatpush.msra.mxu3 %v1616_v12 }
  0x1c   :  { %1291 = vmatmul.msk.f32.gmra.mxu0 %vm46_vm1, %v33_v14 }
  0x1d   :  { %519 = vmatpush.msra.mxu3 %v1621_v13 }
  0x23   :  { %1301 = vmatmul.msk.f32.gmra.mxu1 %vm46_vm1, %v34_v15 }
  0x24   :  { %1292 = vmatmul.msk.f32.gmra.mxu0 %vm46_vm1, %v34_v15 }
  0x2b   :  { %1302 = vmatmul.msk.f32.gmra.mxu1 %vm46_vm1, %v35_v16 }
  0x2c   :  { %1293 = vmatmul.msk.f32.gmra.mxu0 %vm46_vm1, %v35_v16 }
  0x33   :  { %1303 = vmatmul.msk.f32.gmra.mxu1 %vm46_vm1, %v36_v17 }
  0x34   :  { %1294 = vmatmul.msk.f32.gmra.mxu0 %vm46_vm1, %v36_v17 }
  0x3b   :  { %1304 = vmatmul.msk.f32.gmra.mxu1 %vm46_vm1, %v37_v18 }
  0x3c   :  { %1295 = vmatmul.msk.f32.gmra.mxu0 %vm46_vm1, %v37_v18 }
  0x80   :  { %v136_v21 = vpop.f32.mrf.mxu1 }
  0x81   :  { %v1665_v22 = vadd.f32 %v136_v21, %v43_v20  ;;  %v95_v24 = vpop.f32.mrf.mxu0 }
  0x82   :  { %v96_v27 = vadd.f32 %v95_v24, %v1667_v23 }
  0x88   :  { %v139_v25 = vpop.f32.mrf.mxu1 }
  0x89   :  { %v1669_v26 = vadd.f32 %v139_v25, %v43_v20 }
  0x8c   :  { %v207_v28 = vpop.f32.mrf.mxu2 }
  0x8d   :  { %v210_v29 = vadd.f32 %v207_v28, %v96_v27 }
  0x8f   :  { %1344 = vtanh.f32 %v210_v29  ;;  %v1305_v46 = vmul.f32 -1.442695, %v210_v29 }
  0x90   :  { %v142_v30 = vpop.f32.mrf.mxu1 }
  0x91   :  { %v1672_v31 = vadd.f32 %v142_v30, %v43_v20  ;;  %v265_v42 = vpop.f32.mrf.mxu3 }
  0x95   :  { %v1345_v32 = vpop.eup %1344 }
  0x96   :  { %233 = vrot.lane.b32.xlu0 %v1345_v32, %s1501_s0 }
  0x98   :  { %v145_v33 = vpop.f32.mrf.mxu1 }
  0x99   :  { %v1675_v34 = vadd.f32 %v145_v33, %v43_v20 }
  0xa0   :  { %v148_v35 = vpop.f32.mrf.mxu1 }
  0xa1   :  { %v1677_v36 = vadd.f32 %v148_v35, %v43_v20 }
  0xa8   :  { %v151_v37 = vpop.f32.mrf.mxu1 }
  0xa9   :  { %v1679_v38 = vadd.f32 %v151_v37, %v43_v20 }
  0xb0   :  { %v154_v39 = vpop.f32.mrf.mxu1 }
  0xb1   :  { %v1681_v40 = vadd.f32 %v154_v39, %v43_v20 }
  0xb8   :  { %v157_v41 = vpop.f32.mrf.mxu1 }
  0xb9   :  { %v158_v43 = vadd.f32 %v157_v41, %v43_v20 }
  0xbb   :  { %v268_v44 = vadd.f32 %v265_v42, %v158_v43  ;;  %v98_v42 = vpop.f32.mrf.mxu0 }
  0xbc   :  { %v99_v43 = vadd.f32 %v98_v42, %v1667_v23 }
  0xbd   :  { %1346 = vtanh.f32 %v268_v44  ;;  %v1306_v60 = vmul.f32 -1.442695, %v268_v44 }
  0xbe   :  { %1348 = vpow2.f32 %v1305_v46 }
  0xc3   :  { %v1347_v45 = vpop.eup %1346 }
  0xc4   :  { %291 = vrot.lane.b32.xlu0 %v1347_v45, %s1501_s0  ;;  %v1349_v47 = vpop.eup %1348 }
  0xc5   :  { %v214_v48 = vadd.f32 1.0, %v1349_v47 }
  0xc7   :  { %1350 = vrcp.f32 %v214_v48  ;;  %vm220_vm2 = vweird.f32 %v214_v48  ;;  %v226_v53 = vand.u32 2147483648, %v214_v48  ;;  %v224_v55 = vand.u32 2147483647, %v214_v48 }
  0xc8   :  { %1352 = vpow2.f32 %v1306_v60 }
  0xc9   :  { %v227_v56 = vor.u32 1.1754944e-38, %v226_v53  ;;  %vm225_vm5 = vcmp.eq.f32.partialorder %v224_v55, 8.507059e+37 }
  0xcd   :  { %v1351_v49 = vpop.eup %1350 }
  0xce   :  { %v216_v50 = vmul.f32 %v1351_v49, %v214_v48  ;;  %vm221_vm3 = vweird.f32 %v1351_v49  ;;  %v1353_v62 = vpop.eup %1352 }
  0xcf   :  { %vm222_vm4 = vmor %vm220_vm2, %vm221_vm3  ;;  %v272_v63 = vadd.f32 1.0, %v1353_v62 }
  0xd0   :  { %v217_v51 = vsub.f32 1.0, %v216_v50 }
  0xd1   :  { %1354 = vrcp.f32 %v272_v63  ;;  %v284_v11 = vand.u32 2147483648, %v272_v63  ;;  %vm278_vm7 = vweird.f32 %v272_v63  ;;  %v282_v14 = vand.u32 2147483647, %v272_v63 }
  0xd2   :  { %v218_v52 = vmul.f32 %v1351_v49, %v217_v51 }
  0xd3   :  { %v285_v16 = vor.u32 1.1754944e-38, %v284_v11  ;;  %vm283_vm9 = vcmp.eq.f32.partialorder %v282_v14, 8.507059e+37 }
  0xd4   :  { %v219_v54 = vadd.f32 %v1351_v49, %v218_v52 }
  0xd6   :  { %v223_v57 = vsel %vm222_vm4, %v1351_v49, %v219_v54 }
  0xd7   :  { %v228_v59 = vsel %vm225_vm5, %v227_v56, %v223_v57  ;;  %v1355_v0 = vpop.eup %1354 }
  0xd8   :  { %v274_v2 = vmul.f32 %v1355_v0, %v272_v63  ;;  %vm279_vm6 = vweird.f32 %v1355_v0  ;;  %v231_v20 = vmul.f32 0.0, %v228_v59 }
  0xd9   :  { %vm280_vm8 = vmor %vm278_vm7, %vm279_vm6 }
  0xda   :  { %v275_v5 = vsub.f32 1.0, %v274_v2 }
  0xdc   :  { %v276_v7 = vmul.f32 %v1355_v0, %v275_v5 }
  0xde   :  { %v277_v8 = vadd.f32 %v1355_v0, %v276_v7 }
  0xe0   :  { %v281_v15 = vsel %vm280_vm8, %v1355_v0, %v277_v8 }
  0xe1   :  { %v286_v17 = vsel %vm283_vm9, %v285_v16, %v281_v15 }
  0xe2   :  { %v289_v27 = vmul.f32 0.0, %v286_v17 }
 0x108   :  { %v234_v58 = vpop.permute.xlu0 %233 }
 0x109   :  { %v236_v61 = vmul.f32 %v234_v58, %v228_v59 }
 0x10b   :  { %238 = vrot.lane.b32.xlu1 %v236_v61, %s1501_s0 }
 0x136   :  { %v292_v18 = vpop.permute.xlu0 %291 }
 0x137   :  { %v294_v19 = vmul.f32 %v292_v18, %v286_v17 }
 0x139   :  { %296 = vrot.lane.b32.xlu1 %v294_v19, %s1501_s0 }
 0x17d   :  { %v239_v21 = vpop.permute.xlu1 %238 }
 0x17e   :  { %v1686_v24 = vadd.f32 %v239_v21, %v231_v20 }
 0x180   :  { %1356 = vtanh.f32 %v1686_v24 }
 0x186   :  { %v1357_v25 = vpop.eup %1356 }
 0x187   :  { %244 = vrot.lane.b32.xlu2 %v1357_v25, %s1501_s0 }
 0x1ab   :  { %v297_v28 = vpop.permute.xlu1 %296 }
 0x1ac   :  { %v1690_v29 = vadd.f32 %v297_v28, %v289_v27 }
 0x1ae   :  { %1358 = vtanh.f32 %v1690_v29 }
 0x1b4   :  { %v1359_v30 = vpop.eup %1358 }
 0x1b5   :  { %302 = vrot.lane.b32.xlu2 %v1359_v30, %s1501_s0 }
 0x1e1   :  { %v245_v32 = vpop.permute.xlu2 %244 }
 0x1e2   :  { %v247_v33 = vmul.f32 %v245_v32, %v228_v59 }
 0x1e4   :  { %309 = vrot.lane.b32.xlu0 %v247_v33, %s1502_s2 }
 0x20f   :  { %v303_v35 = vpop.permute.xlu2 %302 }
 0x210   :  { %v305_v37 = vmul.f32 %v303_v35, %v286_v17 }
 0x212   :  { %372 = vrot.lane.b32.xlu1 %v305_v37, %s1502_s2 }
 0x256   :  { %v310_v39 = vpop.permute.xlu0 %309 }
 0x257   :  { %1307 = vmatmul.msk.f32.vlgmr.msrb.gmra.mxu2 %vm186_vm10, %v310_v39 }
 0x258   :  { %581 = vmatpush.msrb.mxu2 %v1558_v1 }
 0x25a   :  { %582 = vmatpush.msrb.mxu2 %v1567_v3 }
 0x25c   :  { %583 = vmatpush.msrb.mxu2 %v1573_v4 }
 0x25e   :  { %584 = vmatpush.msrb.mxu2 %v1582_v6 }
 0x284   :  { %v373_v41 = vpop.permute.xlu1 %372 }
 0x285   :  { %1309 = vmatmul.msk.f32.vlgmr.msrb.gmra.mxu3 %vm186_vm10, %v373_v41 }
 0x286   :  { %644 = vmatpush.msrb.mxu3 %v1595_v9 }
 0x288   :  { %645 = vmatpush.msrb.mxu3 %v1600_v10 }
 0x28a   :  { %646 = vmatpush.msrb.mxu3 %v1616_v12 }
 0x28c   :  { %647 = vmatpush.msrb.mxu3 %v1621_v13 }
 0x2da   :  { %v330_v44 = vpop.f32.mrf.mxu2 }
 0x2db   :  { %v333_v45 = vadd.f32 %v330_v44, %v99_v43 }
 0x2dd   :  { %1360 = vtanh.f32 %v333_v45  ;;  %v1308_v50 = vmul.f32 -1.442695, %v333_v45  ;;  %v101_v45 = vpop.f32.mrf.mxu0 }
 0x2e3   :  { %v1361_v46 = vpop.eup %1360 }
 0x2e4   :  { %356 = vrot.lane.b32.xlu2 %v1361_v46, %s1501_s0  ;;  %v102_v46 = vadd.f32 %v101_v45, %v1667_v23 }
 0x308   :  { %v393_v47 = vpop.f32.mrf.mxu3 }
 0x309   :  { %v396_v48 = vadd.f32 %v393_v47, %v1681_v40 }
 0x30b   :  { %1362 = vtanh.f32 %v396_v48  ;;  %v1310_v0 = vmul.f32 -1.442695, %v396_v48 }
 0x30c   :  { %1364 = vpow2.f32 %v1308_v50 }
 0x311   :  { %v1363_v49 = vpop.eup %1362 }
 0x312   :  { %419 = vrot.lane.b32.xlu0 %v1363_v49, %s1501_s0  ;;  %v1365_v51 = vpop.eup %1364 }
 0x313   :  { %v337_v52 = vadd.f32 1.0, %v1365_v51 }
 0x315   :  { %1366 = vrcp.f32 %v337_v52  ;;  %v349_v58 = vand.u32 2147483648, %v337_v52  ;;  %vm343_vm12 = vweird.f32 %v337_v52  ;;  %v347_v59 = vand.u32 2147483647, %v337_v52 }
 0x316   :  { %1368 = vpow2.f32 %v1310_v0 }
 0x317   :  { %v350_v60 = vor.u32 1.1754944e-38, %v349_v58  ;;  %vm348_vm14 = vcmp.eq.f32.partialorder %v347_v59, 8.507059e+37 }
 0x31b   :  { %v1367_v53 = vpop.eup %1366 }
 0x31c   :  { %v339_v54 = vmul.f32 %v1367_v53, %v337_v52  ;;  %vm344_vm11 = vweird.f32 %v1367_v53  ;;  %v1369_v2 = vpop.eup %1368 }
 0x31d   :  { %vm345_vm13 = vmor %vm343_vm12, %vm344_vm11  ;;  %v400_v5 = vadd.f32 1.0, %v1369_v2 }
 0x31e   :  { %v340_v55 = vsub.f32 1.0, %v339_v54 }
 0x31f   :  { %1370 = vrcp.f32 %v400_v5  ;;  %v412_v16 = vand.u32 2147483648, %v400_v5  ;;  %vm406_vm0 = vweird.f32 %v400_v5  ;;  %v410_v17 = vand.u32 2147483647, %v400_v5 }
 0x320   :  { %v341_v56 = vmul.f32 %v1367_v53, %v340_v55 }
 0x321   :  { %v413_v19 = vor.u32 1.1754944e-38, %v412_v16  ;;  %vm411_vm2 = vcmp.eq.f32.partialorder %v410_v17, 8.507059e+37 }
 0x322   :  { %v342_v57 = vadd.f32 %v1367_v53, %v341_v56 }
 0x324   :  { %v346_v40 = vsel %vm345_vm13, %v1367_v53, %v342_v57 }
 0x325   :  { %v351_v61 = vsel %vm348_vm14, %v350_v60, %v346_v40  ;;  %v1371_v7 = vpop.eup %1370 }
 0x326   :  { %v402_v8 = vmul.f32 %v1371_v7, %v400_v5  ;;  %vm407_vm15 = vweird.f32 %v1371_v7  ;;  %v354_v27 = vmul.f32 %v351_v61, %v1686_v24 }
 0x327   :  { %vm408_vm1 = vmor %vm406_vm0, %vm407_vm15 }
 0x328   :  { %v403_v11 = vsub.f32 1.0, %v402_v8 }
 0x32a   :  { %v404_v14 = vmul.f32 %v1371_v7, %v403_v11 }
 0x32c   :  { %v405_v15 = vadd.f32 %v1371_v7, %v404_v14 }
 0x32e   :  { %v409_v18 = vsel %vm408_vm1, %v1371_v7, %v405_v15 }
 0x32f   :  { %v414_v21 = vsel %vm411_vm2, %v413_v19, %v409_v18 }
 0x330   :  { %v417_v33 = vmul.f32 %v414_v21, %v1690_v29 }
 0x33e   :  { %v357_v62 = vpop.permute.xlu2 %356 }
 0x33f   :  { %v359_v63 = vmul.f32 %v357_v62, %v351_v61 }
 0x341   :  { %361 = vrot.lane.b32.xlu1 %v359_v63, %s1501_s0 }
 0x384   :  { %v420_v20 = vpop.permute.xlu0 %419 }
 0x385   :  { %v422_v25 = vmul.f32 %v420_v20, %v414_v21 }
 0x387   :  { %424 = vrot.lane.b32.xlu2 %v422_v25, %s1501_s0 }
 0x3b3   :  { %v362_v28 = vpop.permute.xlu1 %361 }
 0x3b4   :  { %v1713_v30 = vadd.f32 %v362_v28, %v354_v27 }
 0x3b6   :  { %1372 = vtanh.f32 %v1713_v30 }
 0x3bc   :  { %v1373_v32 = vpop.eup %1372 }
 0x3bd   :  { %367 = vrot.lane.b32.xlu0 %v1373_v32, %s1501_s0 }
 0x3e1   :  { %v425_v35 = vpop.permute.xlu2 %424 }
 0x3e2   :  { %v1718_v37 = vadd.f32 %v425_v35, %v417_v33 }
 0x3e4   :  { %1374 = vtanh.f32 %v1718_v37 }
 0x3ea   :  { %v1375_v39 = vpop.eup %1374 }
 0x3eb   :  { %430 = vrot.lane.b32.xlu1 %v1375_v39, %s1501_s0 }
 0x42f   :  { %v368_v41 = vpop.permute.xlu0 %367 }
 0x430   :  { %v370_v24 = vmul.f32 %v368_v41, %v351_v61 }
 0x432   :  { %437 = vrot.lane.b32.xlu2 %v370_v24, %s1502_s2 }
 0x45d   :  { %v431_v42 = vpop.permute.xlu1 %430 }
 0x45e   :  { %v433_v43 = vmul.f32 %v431_v42, %v414_v21 }
 0x460   :  { %500 = vrot.lane.b32.xlu0 %v433_v43, %s1502_s2 }
 0x48c   :  { %v438_v44 = vpop.permute.xlu2 %437 }
 0x48d   :  { %1311 = vmatmul.msk.f32.vlgmr.msra.gmra.mxu2 %vm186_vm10, %v438_v44 }
 0x48e   :  { %709 = vmatpush.msra.mxu2 %v1558_v1 }
 0x490   :  { %710 = vmatpush.msra.mxu2 %v1567_v3 }
 0x492   :  { %711 = vmatpush.msra.mxu2 %v1573_v4 }
 0x494   :  { %712 = vmatpush.msra.mxu2 %v1582_v6 }
 0x4d2   :  { %v501_v29 = vpop.permute.xlu0 %500 }
 0x4d3   :  { %1313 = vmatmul.msk.f32.vlgmr.msra.gmra.mxu3 %vm186_vm10, %v501_v29 }
 0x4d4   :  { %772 = vmatpush.msra.mxu3 %v1595_v9 }
 0x4d6   :  { %773 = vmatpush.msra.mxu3 %v1600_v10 }
 0x4d8   :  { %774 = vmatpush.msra.mxu3 %v1616_v12 }
 0x4da   :  { %775 = vmatpush.msra.mxu3 %v1621_v13 }
 0x510   :  { %v458_v47 = vpop.f32.mrf.mxu2 }
 0x511   :  { %v461_v48 = vadd.f32 %v458_v47, %v102_v46  ;;  %v104_v47 = vpop.f32.mrf.mxu0 }
 0x513   :  { %1376 = vtanh.f32 %v461_v48  ;;  %v1312_v53 = vmul.f32 -1.442695, %v461_v48  ;;  %v105_v48 = vadd.f32 %v104_v47, %v1667_v23 }
 0x519   :  { %v1377_v49 = vpop.eup %1376 }
 0x51a   :  { %484 = vrot.lane.b32.xlu1 %v1377_v49, %s1501_s0 }
 0x556   :  { %v521_v50 = vpop.f32.mrf.mxu3 }
 0x557   :  { %v524_v51 = vadd.f32 %v521_v50, %v1679_v38 }
 0x559   :  { %1378 = vtanh.f32 %v524_v51  ;;  %v1314_v2 = vmul.f32 -1.442695, %v524_v51 }
 0x55a   :  { %1380 = vpow2.f32 %v1312_v53 }
 0x55f   :  { %v1379_v52 = vpop.eup %1378 }
 0x560   :  { %547 = vrot.lane.b32.xlu2 %v1379_v52, %s1501_s0  ;;  %v1381_v54 = vpop.eup %1380 }
 0x561   :  { %v465_v55 = vadd.f32 1.0, %v1381_v54 }
 0x563   :  { %1382 = vrcp.f32 %v465_v55  ;;  %v477_v60 = vand.u32 2147483648, %v465_v55  ;;  %vm471_vm4 = vweird.f32 %v465_v55  ;;  %v475_v61 = vand.u32 2147483647, %v465_v55 }
 0x564   :  { %1384 = vpow2.f32 %v1314_v2 }
 0x565   :  { %v478_v62 = vor.u32 1.1754944e-38, %v477_v60  ;;  %vm476_vm6 = vcmp.eq.f32.partialorder %v475_v61, 8.507059e+37 }
 0x569   :  { %v1383_v56 = vpop.eup %1382 }
 0x56a   :  { %v467_v57 = vmul.f32 %v1383_v56, %v465_v55  ;;  %vm472_vm3 = vweird.f32 %v1383_v56  ;;  %v1385_v7 = vpop.eup %1384 }
 0x56b   :  { %vm473_vm5 = vmor %vm471_vm4, %vm472_vm3  ;;  %v528_v8 = vadd.f32 1.0, %v1385_v7 }
 0x56c   :  { %v468_v58 = vsub.f32 1.0, %v467_v57 }
 0x56d   :  { %1386 = vrcp.f32 %v528_v8  ;;  %v540_v18 = vand.u32 2147483648, %v528_v8  ;;  %vm534_vm8 = vweird.f32 %v528_v8  ;;  %v538_v19 = vand.u32 2147483647, %v528_v8 }
 0x56e   :  { %v469_v59 = vmul.f32 %v1383_v56, %v468_v58 }
 0x56f   :  { %v541_v21 = vor.u32 1.1754944e-38, %v540_v18  ;;  %vm539_vm11 = vcmp.eq.f32.partialorder %v538_v19, 8.507059e+37 }
 0x570   :  { %v470_v40 = vadd.f32 %v1383_v56, %v469_v59 }
 0x572   :  { %v474_v38 = vsel %vm473_vm5, %v1383_v56, %v470_v40 }
 0x573   :  { %v479_v0 = vsel %vm476_vm6, %v478_v62, %v474_v38  ;;  %v1387_v11 = vpop.eup %1386 }
 0x574   :  { %v530_v14 = vmul.f32 %v1387_v11, %v528_v8  ;;  %vm535_vm7 = vweird.f32 %v1387_v11  ;;  %v482_v32 = vmul.f32 %v479_v0, %v1713_v30 }
 0x575   :  { %vm536_vm9 = vmor %vm534_vm8, %vm535_vm7 }
 0x576   :  { %v531_v15 = vsub.f32 1.0, %v530_v14 }
 0x578   :  { %v532_v16 = vmul.f32 %v1387_v11, %v531_v15 }
 0x57a   :  { %v533_v17 = vadd.f32 %v1387_v11, %v532_v16 }
 0x57c   :  { %v537_v20 = vsel %vm536_vm9, %v1387_v11, %v533_v17 }
 0x57d   :  { %v542_v25 = vsel %vm539_vm11, %v541_v21, %v537_v20 }
 0x57e   :  { %v545_v41 = vmul.f32 %v542_v25, %v1718_v37 }
 0x58c   :  { %v485_v63 = vpop.permute.xlu1 %484 }
 0x58d   :  { %v487_v5 = vmul.f32 %v485_v63, %v479_v0 }
 0x58f   :  { %489 = vrot.lane.b32.xlu0 %v487_v5, %s1501_s0 }
 0x5ba   :  { %v548_v27 = vpop.permute.xlu2 %547 }
 0x5bb   :  { %v550_v28 = vmul.f32 %v548_v27, %v542_v25 }
 0x5bd   :  { %552 = vrot.lane.b32.xlu1 %v550_v28, %s1501_s0 }
 0x601   :  { %v490_v33 = vpop.permute.xlu0 %489 }
 0x602   :  { %v1741_v35 = vadd.f32 %v490_v33, %v482_v32 }
 0x604   :  { %1388 = vtanh.f32 %v1741_v35 }
 0x60a   :  { %v1389_v39 = vpop.eup %1388 }
 0x60b   :  { %495 = vrot.lane.b32.xlu2 %v1389_v39, %s1501_s0 }
 0x62f   :  { %v553_v24 = vpop.permute.xlu1 %552 }
 0x630   :  { %v1746_v42 = vadd.f32 %v553_v24, %v545_v41 }
 0x632   :  { %1390 = vtanh.f32 %v1746_v42 }
 0x638   :  { %v1391_v43 = vpop.eup %1390 }
 0x639   :  { %558 = vrot.lane.b32.xlu0 %v1391_v43, %s1501_s0 }
 0x665   :  { %v496_v44 = vpop.permute.xlu2 %495 }
 0x666   :  { %v498_v30 = vmul.f32 %v496_v44, %v479_v0 }
 0x668   :  { %565 = vrot.lane.b32.xlu1 %v498_v30, %s1502_s2 }
 0x6ab   :  { %v559_v29 = vpop.permute.xlu0 %558 }
 0x6ac   :  { %v561_v45 = vmul.f32 %v559_v29, %v542_v25 }
 0x6ae   :  { %628 = vrot.lane.b32.xlu2 %v561_v45, %s1502_s2 }
 0x6da   :  { %v566_v46 = vpop.permute.xlu1 %565 }
 0x6db   :  { %1315 = vmatmul.msk.f32.vlgmr.msrb.gmra.mxu2 %vm186_vm10, %v566_v46 }
 0x6dc   :  { %837 = vmatpush.msrb.mxu2 %v1558_v1 }
 0x6de   :  { %838 = vmatpush.msrb.mxu2 %v1567_v3 }
 0x6e0   :  { %839 = vmatpush.msrb.mxu2 %v1573_v4 }
 0x6e2   :  { %840 = vmatpush.msrb.mxu2 %v1582_v6 }
 0x708   :  { %v629_v37 = vpop.permute.xlu2 %628 }
 0x709   :  { %1317 = vmatmul.msk.f32.vlgmr.msrb.gmra.mxu3 %vm186_vm10, %v629_v37 }
 0x70a   :  { %900 = vmatpush.msrb.mxu3 %v1595_v9 }
 0x70c   :  { %901 = vmatpush.msrb.mxu3 %v1600_v10 }
 0x70e   :  { %902 = vmatpush.msrb.mxu3 %v1616_v12 }
 0x710   :  { %903 = vmatpush.msrb.mxu3 %v1621_v13 }
 0x75e   :  { %v586_v49 = vpop.f32.mrf.mxu2 }
 0x75f   :  { %v589_v50 = vadd.f32 %v586_v49, %v105_v48  ;;  %v107_v48 = vpop.f32.mrf.mxu0 }
 0x760   :  { %v108_v49 = vadd.f32 %v107_v48, %v1667_v23 }
 0x761   :  { %1392 = vtanh.f32 %v589_v50  ;;  %v1316_v55 = vmul.f32 -1.442695, %v589_v50 }
 0x767   :  { %v1393_v51 = vpop.eup %1392  ;;  %v110_v48 = vpop.f32.mrf.mxu0 }
 0x768   :  { %612 = vrot.lane.b32.xlu0 %v1393_v51, %s1501_s0 }
 0x78c   :  { %v649_v52 = vpop.f32.mrf.mxu3 }
 0x78d   :  { %v652_v53 = vadd.f32 %v649_v52, %v1677_v36 }
 0x78f   :  { %1394 = vtanh.f32 %v652_v53  ;;  %v1318_v5 = vmul.f32 -1.442695, %v652_v53 }
 0x790   :  { %1396 = vpow2.f32 %v1316_v55 }
 0x795   :  { %v1395_v54 = vpop.eup %1394 }
 0x796   :  { %675 = vrot.lane.b32.xlu1 %v1395_v54, %s1501_s0  ;;  %v1397_v56 = vpop.eup %1396 }
 0x797   :  { %v593_v57 = vadd.f32 1.0, %v1397_v56 }
 0x799   :  { %1398 = vrcp.f32 %v593_v57  ;;  %v605_v38 = vand.u32 2147483648, %v593_v57  ;;  %vm599_vm13 = vweird.f32 %v593_v57  ;;  %v603_v62 = vand.u32 2147483647, %v593_v57 }
 0x79a   :  { %1400 = vpow2.f32 %v1318_v5 }
 0x79b   :  { %v606_v63 = vor.u32 1.1754944e-38, %v605_v38  ;;  %vm604_vm15 = vcmp.eq.f32.partialorder %v603_v62, 8.507059e+37 }
 0x79f   :  { %v1399_v58 = vpop.eup %1398 }
 0x7a0   :  { %v595_v59 = vmul.f32 %v1399_v58, %v593_v57  ;;  %vm600_vm12 = vweird.f32 %v1399_v58  ;;  %v1401_v8 = vpop.eup %1400 }
 0x7a1   :  { %vm601_vm14 = vmor %vm599_vm13, %vm600_vm12  ;;  %v656_v11 = vadd.f32 1.0, %v1401_v8 }
 0x7a2   :  { %v596_v40 = vsub.f32 1.0, %v595_v59 }
 0x7a3   :  { %1402 = vrcp.f32 %v656_v11  ;;  %v668_v19 = vand.u32 2147483648, %v656_v11  ;;  %vm662_vm1 = vweird.f32 %v656_v11  ;;  %v666_v20 = vand.u32 2147483647, %v656_v11 }
 0x7a4   :  { %v597_v60 = vmul.f32 %v1399_v58, %v596_v40 }
 0x7a5   :  { %v669_v25 = vor.u32 1.1754944e-38, %v668_v19  ;;  %vm667_vm3 = vcmp.eq.f32.partialorder %v666_v20, 8.507059e+37 }
 0x7a6   :  { %v598_v61 = vadd.f32 %v1399_v58, %v597_v60 }
 0x7a8   :  { %v602_v36 = vsel %vm601_vm14, %v1399_v58, %v598_v61 }
 0x7a9   :  { %v607_v2 = vsel %vm604_vm15, %v606_v63, %v602_v36  ;;  %v1403_v14 = vpop.eup %1402 }
 0x7aa   :  { %v658_v15 = vmul.f32 %v1403_v14, %v656_v11  ;;  %vm663_vm0 = vweird.f32 %v1403_v14  ;;  %v610_v33 = vmul.f32 %v607_v2, %v1741_v35 }
 0x7ab   :  { %vm664_vm2 = vmor %vm662_vm1, %vm663_vm0 }
 0x7ac   :  { %v659_v16 = vsub.f32 1.0, %v658_v15 }
 0x7ae   :  { %v660_v17 = vmul.f32 %v1403_v14, %v659_v16 }
 0x7b0   :  { %v661_v18 = vadd.f32 %v1403_v14, %v660_v17 }
 0x7b2   :  { %v665_v21 = vsel %vm664_vm2, %v1403_v14, %v661_v18 }
 0x7b3   :  { %v670_v28 = vsel %vm667_vm3, %v669_v25, %v665_v21 }
 0x7b4   :  { %v673_v43 = vmul.f32 %v670_v28, %v1746_v42 }
 0x7da   :  { %v613_v0 = vpop.permute.xlu0 %612 }
 0x7db   :  { %v615_v7 = vmul.f32 %v613_v0, %v607_v2 }
 0x7dd   :  { %617 = vrot.lane.b32.xlu2 %v615_v7, %s1501_s0 }
 0x808   :  { %v676_v27 = vpop.permute.xlu1 %675 }
 0x809   :  { %v678_v32 = vmul.f32 %v676_v27, %v670_v28 }
 0x80b   :  { %680 = vrot.lane.b32.xlu0 %v678_v32, %s1501_s0 }
 0x837   :  { %v618_v39 = vpop.permute.xlu2 %617 }
 0x838   :  { %v1769_v41 = vadd.f32 %v618_v39, %v610_v33 }
 0x83a   :  { %1404 = vtanh.f32 %v1769_v41 }
 0x840   :  { %v1405_v24 = vpop.eup %1404 }
 0x841   :  { %623 = vrot.lane.b32.xlu1 %v1405_v24, %s1501_s0 }
 0x87d   :  { %v681_v44 = vpop.permute.xlu0 %680 }
 0x87e   :  { %v1774_v30 = vadd.f32 %v681_v44, %v673_v43 }
 0x880   :  { %1406 = vtanh.f32 %v1774_v30 }
 0x886   :  { %v1407_v29 = vpop.eup %1406 }
 0x887   :  { %686 = vrot.lane.b32.xlu2 %v1407_v29, %s1501_s0 }
 0x8b3   :  { %v624_v45 = vpop.permute.xlu1 %623 }
 0x8b4   :  { %v626_v35 = vmul.f32 %v624_v45, %v607_v2 }
 0x8b6   :  { %693 = vrot.lane.b32.xlu0 %v626_v35, %s1502_s2 }
 0x8e1   :  { %v687_v46 = vpop.permute.xlu2 %686 }
 0x8e2   :  { %v689_v37 = vmul.f32 %v687_v46, %v670_v28 }
 0x8e4   :  { %756 = vrot.lane.b32.xlu1 %v689_v37, %s1502_s2 }
 0x928   :  { %v694_v47 = vpop.permute.xlu0 %693 }
 0x929   :  { %1319 = vmatmul.msk.f32.vlgmr.msra.gmra.mxu2 %vm186_vm10, %v694_v47 }
 0x92a   :  { %965 = vmatpush.msra.mxu2 %v1558_v1 }
 0x92c   :  { %966 = vmatpush.msra.mxu2 %v1567_v3 }
 0x92e   :  { %967 = vmatpush.msra.mxu2 %v1573_v4 }
 0x930   :  { %968 = vmatpush.msra.mxu2 %v1582_v6 }
 0x956   :  { %v757_v42 = vpop.permute.xlu1 %756 }
 0x957   :  { %1321 = vmatmul.msk.f32.vlgmr.msra.gmra.mxu3 %vm186_vm10, %v757_v42 }
 0x958   :  { %1028 = vmatpush.msra.mxu3 %v1595_v9 }
 0x95a   :  { %1029 = vmatpush.msra.mxu3 %v1600_v10 }
 0x95c   :  { %1030 = vmatpush.msra.mxu3 %v1616_v12 }
 0x95e   :  { %1031 = vmatpush.msra.mxu3 %v1621_v13 }
 0x9ac   :  { %v714_v50 = vpop.f32.mrf.mxu2 }
 0x9ad   :  { %v717_v51 = vadd.f32 %v714_v50, %v108_v49 }
 0x9af   :  { %1408 = vtanh.f32 %v717_v51  ;;  %v1320_v56 = vmul.f32 -1.442695, %v717_v51 }
 0x9b5   :  { %v1409_v52 = vpop.eup %1408 }
 0x9b6   :  { %740 = vrot.lane.b32.xlu2 %v1409_v52, %s1501_s0 }
 0x9da   :  { %v777_v53 = vpop.f32.mrf.mxu3 }
 0x9db   :  { %v780_v54 = vadd.f32 %v777_v53, %v1675_v34 }
 0x9dd   :  { %1410 = vtanh.f32 %v780_v54  ;;  %v1322_v7 = vmul.f32 -1.442695, %v780_v54 }
 0x9de   :  { %1412 = vpow2.f32 %v1320_v56 }
 0x9e3   :  { %v1411_v55 = vpop.eup %1410 }
 0x9e4   :  { %803 = vrot.lane.b32.xlu0 %v1411_v55, %s1501_s0  ;;  %v1413_v57 = vpop.eup %1412 }
 0x9e5   :  { %v721_v58 = vadd.f32 1.0, %v1413_v57 }
 0x9e7   :  { %1414 = vrcp.f32 %v721_v58  ;;  %v733_v62 = vand.u32 2147483648, %v721_v58  ;;  %vm727_vm5 = vweird.f32 %v721_v58  ;;  %v731_v36 = vand.u32 2147483647, %v721_v58 }
 0x9e8   :  { %1416 = vpow2.f32 %v1322_v7 }
 0x9e9   :  { %v734_v63 = vor.u32 1.1754944e-38, %v733_v62  ;;  %vm732_vm7 = vcmp.eq.f32.partialorder %v731_v36, 8.507059e+37 }
 0x9ed   :  { %v1415_v59 = vpop.eup %1414 }
 0x9ee   :  { %v723_v40 = vmul.f32 %v1415_v59, %v721_v58  ;;  %vm728_vm4 = vweird.f32 %v1415_v59  ;;  %v1417_v8 = vpop.eup %1416 }
 0x9ef   :  { %vm729_vm6 = vmor %vm727_vm5, %vm728_vm4  ;;  %v784_v11 = vadd.f32 1.0, %v1417_v8 }
 0x9f0   :  { %v724_v60 = vsub.f32 1.0, %v723_v40 }
 0x9f1   :  { %1418 = vrcp.f32 %v784_v11  ;;  %v796_v19 = vand.u32 2147483648, %v784_v11  ;;  %vm790_vm9 = vweird.f32 %v784_v11  ;;  %v794_v20 = vand.u32 2147483647, %v784_v11 }
 0x9f2   :  { %v725_v61 = vmul.f32 %v1415_v59, %v724_v60 }
 0x9f3   :  { %v797_v25 = vor.u32 1.1754944e-38, %v796_v19  ;;  %vm795_vm12 = vcmp.eq.f32.partialorder %v794_v20, 8.507059e+37 }
 0x9f4   :  { %v726_v38 = vadd.f32 %v1415_v59, %v725_v61 }
 0x9f6   :  { %v730_v34 = vsel %vm729_vm6, %v1415_v59, %v726_v38 }
 0x9f7   :  { %v735_v0 = vsel %vm732_vm7, %v734_v63, %v730_v34  ;;  %v1419_v14 = vpop.eup %1418 }
 0x9f8   :  { %v786_v15 = vmul.f32 %v1419_v14, %v784_v11  ;;  %vm791_vm8 = vweird.f32 %v1419_v14  ;;  %v738_v33 = vmul.f32 %v735_v0, %v1769_v41 }
 0x9f9   :  { %vm792_vm11 = vmor %vm790_vm9, %vm791_vm8 }
 0x9fa   :  { %v787_v16 = vsub.f32 1.0, %v786_v15 }
 0x9fc   :  { %v788_v17 = vmul.f32 %v1419_v14, %v787_v16 }
 0x9fe   :  { %v789_v18 = vadd.f32 %v1419_v14, %v788_v17 }
 0xa00   :  { %v793_v21 = vsel %vm792_vm11, %v1419_v14, %v789_v18 }
 0xa01   :  { %v798_v28 = vsel %vm795_vm12, %v797_v25, %v793_v21 }
 0xa02   :  { %v801_v44 = vmul.f32 %v798_v28, %v1774_v30 }
 0xa10   :  { %v741_v2 = vpop.permute.xlu2 %740 }
 0xa11   :  { %v743_v5 = vmul.f32 %v741_v2, %v735_v0 }
 0xa13   :  { %745 = vrot.lane.b32.xlu1 %v743_v5, %s1501_s0 }
 0xa56   :  { %v804_v27 = vpop.permute.xlu0 %803 }
 0xa57   :  { %v806_v32 = vmul.f32 %v804_v27, %v798_v28 }
 0xa59   :  { %808 = vrot.lane.b32.xlu2 %v806_v32, %s1501_s0 }
 0xa85   :  { %v746_v39 = vpop.permute.xlu1 %745 }
 0xa86   :  { %v1797_v24 = vadd.f32 %v746_v39, %v738_v33 }
 0xa88   :  { %1420 = vtanh.f32 %v1797_v24 }
 0xa8e   :  { %v1421_v43 = vpop.eup %1420 }
 0xa8f   :  { %751 = vrot.lane.b32.xlu0 %v1421_v43, %s1501_s0 }
 0xab3   :  { %v809_v29 = vpop.permute.xlu2 %808 }
 0xab4   :  { %v1802_v45 = vadd.f32 %v809_v29, %v801_v44  ;;  %v113_v29 = vpop.f32.mrf.mxu0 }
 0xab6   :  { %1422 = vtanh.f32 %v1802_v45 }
 0xabc   :  { %v1423_v35 = vpop.eup %1422 }
 0xabd   :  { %814 = vrot.lane.b32.xlu1 %v1423_v35, %s1501_s0 }
 0xb01   :  { %v752_v46 = vpop.permute.xlu0 %751 }
 0xb02   :  { %v754_v41 = vmul.f32 %v752_v46, %v735_v0 }
 0xb04   :  { %821 = vrot.lane.b32.xlu2 %v754_v41, %s1502_s2 }
 0xb2f   :  { %v815_v37 = vpop.permute.xlu1 %814 }
 0xb30   :  { %v817_v47 = vmul.f32 %v815_v37, %v798_v28 }
 0xb32   :  { %884 = vrot.lane.b32.xlu0 %v817_v47, %s1502_s2 }
 0xb5e   :  { %v822_v42 = vpop.permute.xlu2 %821 }
 0xb5f   :  { %1323 = vmatmul.msk.f32.vlgmr.msrb.gmra.mxu2 %vm186_vm10, %v822_v42 }
 0xb60   :  { %1093 = vmatpush.msrb.mxu2 %v1558_v1  ;;  %v111_v1 = vadd.f32 %v110_v48, %v1667_v23 }
 0xb62   :  { %1094 = vmatpush.msrb.mxu2 %v1567_v3 }
 0xb64   :  { %1095 = vmatpush.msrb.mxu2 %v1573_v4 }
 0xb66   :  { %1096 = vmatpush.msrb.mxu2 %v1582_v6 }
 0xba4   :  { %v885_v30 = vpop.permute.xlu0 %884 }
 0xba5   :  { %1325 = vmatmul.msk.f32.vlgmr.msrb.gmra.mxu3 %vm186_vm10, %v885_v30 }
 0xba6   :  { %1156 = vmatpush.msrb.mxu3 %v1595_v9 }
 0xba8   :  { %1157 = vmatpush.msrb.mxu3 %v1600_v10 }
 0xbaa   :  { %1158 = vmatpush.msrb.mxu3 %v1616_v12 }
 0xbac   :  { %1159 = vmatpush.msrb.mxu3 %v1621_v13 }
 0xbe2   :  { %v842_v49 = vpop.f32.mrf.mxu2 }
 0xbe3   :  { %v845_v3 = vadd.f32 %v842_v49, %v111_v1 }
 0xbe5   :  { %1424 = vtanh.f32 %v845_v3  ;;  %v1324_v51 = vmul.f32 -1.442695, %v845_v3 }
 0xbeb   :  { %v1425_v4 = vpop.eup %1424 }
 0xbec   :  { %868 = vrot.lane.b32.xlu1 %v1425_v4, %s1501_s0 }
 0xc28   :  { %v905_v6 = vpop.f32.mrf.mxu3 }
 0xc29   :  { %v908_v50 = vadd.f32 %v905_v6, %v1672_v31 }
 0xc2b   :  { %1426 = vtanh.f32 %v908_v50  ;;  %v1326_v60 = vmul.f32 -1.442695, %v908_v50 }
 0xc2c   :  { %1428 = vpow2.f32 %v1324_v51 }
 0xc31   :  { %v1427_v9 = vpop.eup %1426 }
 0xc32   :  { %931 = vrot.lane.b32.xlu2 %v1427_v9, %s1501_s0  ;;  %v1429_v10 = vpop.eup %1428 }
 0xc33   :  { %v849_v12 = vadd.f32 1.0, %v1429_v10 }
 0xc35   :  { %1430 = vrcp.f32 %v849_v12  ;;  %v861_v56 = vand.u32 2147483648, %v849_v12  ;;  %vm855_vm14 = vweird.f32 %v849_v12  ;;  %v859_v57 = vand.u32 2147483647, %v849_v12 }
 0xc36   :  { %1432 = vpow2.f32 %v1326_v60 }
 0xc37   :  { %v862_v58 = vor.u32 1.1754944e-38, %v861_v56  ;;  %vm860_vm0 = vcmp.eq.f32.partialorder %v859_v57, 8.507059e+37 }
 0xc3b   :  { %v1431_v13 = vpop.eup %1430 }
 0xc3c   :  { %v851_v52 = vmul.f32 %v1431_v13, %v849_v12  ;;  %vm856_vm13 = vweird.f32 %v1431_v13  ;;  %v1433_v38 = vpop.eup %1432 }
 0xc3d   :  { %vm857_vm15 = vmor %vm855_vm14, %vm856_vm13  ;;  %v912_v62 = vadd.f32 1.0, %v1433_v38 }
 0xc3e   :  { %v852_v53 = vsub.f32 1.0, %v851_v52 }
 0xc3f   :  { %1434 = vrcp.f32 %v912_v62  ;;  %v924_v5 = vand.u32 2147483648, %v912_v62  ;;  %vm918_vm2 = vweird.f32 %v912_v62  ;;  %v922_v7 = vand.u32 2147483647, %v912_v62 }
 0xc40   :  { %v853_v54 = vmul.f32 %v1431_v13, %v852_v53 }
 0xc41   :  { %v925_v11 = vor.u32 1.1754944e-38, %v924_v5  ;;  %vm923_vm4 = vcmp.eq.f32.partialorder %v922_v7, 8.507059e+37 }
 0xc42   :  { %v854_v55 = vadd.f32 %v1431_v13, %v853_v54 }
 0xc44   :  { %v858_v31 = vsel %vm857_vm15, %v1431_v13, %v854_v55 }
 0xc45   :  { %v863_v40 = vsel %vm860_vm0, %v862_v58, %v858_v31  ;;  %v1435_v36 = vpop.eup %1434 }
 0xc46   :  { %v914_v34 = vmul.f32 %v1435_v36, %v912_v62  ;;  %vm919_vm1 = vweird.f32 %v1435_v36  ;;  %v866_v17 = vmul.f32 %v863_v40, %v1797_v24 }
 0xc47   :  { %vm920_vm3 = vmor %vm918_vm2, %vm919_vm1 }
 0xc48   :  { %v915_v63 = vsub.f32 1.0, %v914_v34 }
 0xc4a   :  { %v916_v0 = vmul.f32 %v1435_v36, %v915_v63 }
 0xc4c   :  { %v917_v2 = vadd.f32 %v1435_v36, %v916_v0 }
 0xc4e   :  { %v921_v8 = vsel %vm920_vm3, %v1435_v36, %v917_v2 }
 0xc4f   :  { %v926_v14 = vsel %vm923_vm4, %v925_v11, %v921_v8 }
 0xc50   :  { %v929_v21 = vmul.f32 %v926_v14, %v1802_v45  ;;  %v114_v45 = vadd.f32 %v113_v29, %v1667_v23 }
 0xc5e   :  { %v869_v59 = vpop.permute.xlu1 %868 }
 0xc5f   :  { %v871_v61 = vmul.f32 %v869_v59, %v863_v40 }
 0xc61   :  { %873 = vrot.lane.b32.xlu0 %v871_v61, %s1501_s0 }
 0xc8c   :  { %v932_v15 = vpop.permute.xlu2 %931 }
 0xc8d   :  { %v934_v16 = vmul.f32 %v932_v15, %v926_v14 }
 0xc8f   :  { %936 = vrot.lane.b32.xlu1 %v934_v16, %s1501_s0 }
 0xcd3   :  { %v874_v18 = vpop.permute.xlu0 %873 }
 0xcd4   :  { %v1825_v19 = vadd.f32 %v874_v18, %v866_v17 }
 0xcd6   :  { %1436 = vtanh.f32 %v1825_v19 }
 0xcdc   :  { %v1437_v20 = vpop.eup %1436 }
 0xcdd   :  { %879 = vrot.lane.b32.xlu2 %v1437_v20, %s1501_s0 }
 0xd01   :  { %v937_v25 = vpop.permute.xlu1 %936 }
 0xd02   :  { %v1830_v27 = vadd.f32 %v937_v25, %v929_v21  ;;  %v116_v21 = vpop.f32.mrf.mxu0 }
 0xd03   :  { %v117_v25 = vadd.f32 %v116_v21, %v1667_v23 }
 0xd04   :  { %1438 = vtanh.f32 %v1830_v27 }
 0xd0a   :  { %v1439_v28 = vpop.eup %1438 }
 0xd0b   :  { %942 = vrot.lane.b32.xlu0 %v1439_v28, %s1501_s0 }
 0xd37   :  { %v880_v32 = vpop.permute.xlu2 %879 }
 0xd38   :  { %v882_v33 = vmul.f32 %v880_v32, %v863_v40 }
 0xd3a   :  { %949 = vrot.lane.b32.xlu1 %v882_v33, %s1502_s2 }
 0xd7d   :  { %v943_v39 = vpop.permute.xlu0 %942 }
 0xd7e   :  { %v945_v24 = vmul.f32 %v943_v39, %v926_v14 }
 0xd80   :  { %1012 = vrot.lane.b32.xlu2 %v945_v24, %s1502_s2 }
 0xdac   :  { %v950_v43 = vpop.permute.xlu1 %949 }
 0xdad   :  { %1327 = vmatmul.msk.f32.vlgmr.msra.gmra.mxu2 %vm186_vm10, %v950_v43 }
 0xdda   :  { %v1013_v44 = vpop.permute.xlu2 %1012 }
 0xddb   :  { %1329 = vmatmul.msk.f32.vlgmr.msra.gmra.mxu3 %vm186_vm10, %v1013_v44 }
 0xe30   :  { %v970_v35 = vpop.f32.mrf.mxu2 }
 0xe31   :  { %v973_v46 = vadd.f32 %v970_v35, %v114_v45 }
 0xe33   :  { %1440 = vtanh.f32 %v973_v46  ;;  %v1328_v30 = vmul.f32 -1.442695, %v973_v46 }
 0xe39   :  { %v1441_v41 = vpop.eup %1440 }
 0xe3a   :  { %996 = vrot.lane.b32.xlu0 %v1441_v41, %s1501_s0 }
 0xe5e   :  { %v1033_v37 = vpop.f32.mrf.mxu3 }
 0xe5f   :  { %v1036_v47 = vadd.f32 %v1033_v37, %v1669_v26 }
 0xe61   :  { %1442 = vtanh.f32 %v1036_v47  ;;  %v1330_v52 = vmul.f32 -1.442695, %v1036_v47 }
 0xe62   :  { %1444 = vpow2.f32 %v1328_v30 }
 0xe67   :  { %v1443_v42 = vpop.eup %1442 }
 0xe68   :  { %1059 = vrot.lane.b32.xlu1 %v1443_v42, %s1501_s0  ;;  %v1445_v48 = vpop.eup %1444 }
 0xe69   :  { %v977_v1 = vadd.f32 1.0, %v1445_v48 }
 0xe6b   :  { %1446 = vrcp.f32 %v977_v1  ;;  %v989_v9 = vand.u32 2147483648, %v977_v1  ;;  %vm983_vm6 = vweird.f32 %v977_v1  ;;  %v987_v51 = vand.u32 2147483647, %v977_v1 }
 0xe6c   :  { %1448 = vpow2.f32 %v1330_v52 }
 0xe6d   :  { %v990_v10 = vor.u32 1.1754944e-38, %v989_v9  ;;  %vm988_vm8 = vcmp.eq.f32.partialorder %v987_v51, 8.507059e+37 }
 0xe71   :  { %v1447_v49 = vpop.eup %1446 }
 0xe72   :  { %v979_v3 = vmul.f32 %v1447_v49, %v977_v1  ;;  %vm984_vm5 = vweird.f32 %v1447_v49  ;;  %v1449_v54 = vpop.eup %1448 }
 0xe73   :  { %vm985_vm7 = vmor %vm983_vm6, %vm984_vm5  ;;  %v1040_v55 = vadd.f32 1.0, %v1449_v54  ;;  %vm1223_vm6 = vcmask 523264  }
 0xe74   :  { %v980_v4 = vsub.f32 1.0, %v979_v3 }
 0xe75   :  { %1450 = vrcp.f32 %v1040_v55  ;;  %v1052_v40 = vand.u32 2147483648, %v1040_v55  ;;  %vm1046_vm11 = vweird.f32 %v1040_v55  ;;  %v1050_v60 = vand.u32 2147483647, %v1040_v55 }
 0xe76   :  { %v981_v6 = vmul.f32 %v1447_v49, %v980_v4 }
 0xe77   :  { %v1053_v38 = vor.u32 1.1754944e-38, %v1052_v40  ;;  %vm1051_vm13 = vcmp.eq.f32.partialorder %v1050_v60, 8.507059e+37 }
 0xe78   :  { %v982_v50 = vadd.f32 %v1447_v49, %v981_v6 }
 0xe7a   :  { %v986_v26 = vsel %vm985_vm7, %v1447_v49, %v982_v50  ;;  %vm1265_vm7 = vcmask 130048  }
 0xe7b   :  { %v991_v13 = vsel %vm988_vm8, %v990_v10, %v986_v26  ;;  %v1451_v56 = vpop.eup %1450  ;;  %vm1268_vm8 = vcmask 392192  }
 0xe7c   :  { %v1042_v57 = vmul.f32 %v1451_v56, %v1040_v55  ;;  %vm1047_vm9 = vweird.f32 %v1451_v56  ;;  %v994_v63 = vmul.f32 %v991_v13, %v1825_v19 }
 0xe7d   :  { %vm1048_vm12 = vmor %vm1046_vm11, %vm1047_vm9 }
 0xe7e   :  { %v1043_v31 = vsub.f32 1.0, %v1042_v57 }
 0xe80   :  { %v1044_v58 = vmul.f32 %v1451_v56, %v1043_v31 }
 0xe82   :  { %v1045_v59 = vadd.f32 %v1451_v56, %v1044_v58 }
 0xe84   :  { %v1049_v61 = vsel %vm1048_vm12, %v1451_v56, %v1045_v59 }
 0xe85   :  { %v1054_v36 = vsel %vm1051_vm13, %v1053_v38, %v1049_v61 }
 0xe86   :  { %v1057_v7 = vmul.f32 %v1054_v36, %v1830_v27 }
 0xeac   :  { %v997_v12 = vpop.permute.xlu0 %996 }
 0xead   :  { %v999_v53 = vmul.f32 %v997_v12, %v991_v13 }
 0xeaf   :  { %1001 = vrot.lane.b32.xlu2 %v999_v53, %s1501_s0 }
 0xeda   :  { %v1060_v62 = vpop.permute.xlu1 %1059 }
 0xedb   :  { %v1062_v34 = vmul.f32 %v1060_v62, %v1054_v36 }
 0xedd   :  { %1064 = vrot.lane.b32.xlu0 %v1062_v34, %s1501_s0 }
 0xf09   :  { %v1002_v0 = vpop.permute.xlu2 %1001 }
 0xf0a   :  { %v1845_v2 = vadd.f32 %v1002_v0, %v994_v63  ;;  %v1218_v63 = vld [vmem:[%s1909_s5 + $0x38] sm:$0xff]  ;;  %v1217_v0 = vld [vmem:[%s1909_s5 + $0x30] sm:$0xff] }
 0xf0b   :  { %1235 = vmatpush.msrb.mxu0 %v1218_v63 }
 0xf0c   :  { %1452 = vtanh.f32 %v1845_v2 }
 0xf0d   :  { %1236 = vmatpush.msrb.mxu0 %v1217_v0 }
 0xf12   :  { %v1453_v5 = vpop.eup %1452 }
 0xf13   :  { %1007 = vrot.lane.b32.xlu1 %v1453_v5, %s1501_s0  ;;  %v1215_v5 = vld [vmem:[%s1909_s5 + $0x20] sm:$0xff] }
 0xf4f   :  { %v1065_v8 = vpop.permute.xlu0 %1064 }
 0xf50   :  { %v1850_v11 = vadd.f32 %v1065_v8, %v1057_v7  ;;  %v1214_v7 = vld [vmem:[%s1909_s5 + $0x18] sm:$0xff]  ;;  %v1213_v8 = vld [vmem:[%s1909_s5 + $0x10] sm:$0xff] }
 0xf52   :  { %1454 = vtanh.f32 %v1850_v11 }
 0xf58   :  { %v1455_v14 = vpop.eup %1454 }
 0xf59   :  { %1070 = vrot.lane.b32.xlu2 %v1455_v14, %s1501_s0  ;;  %v1211_v14 = vld [vmem:[%s1909_s5] sm:$0xff] }
 0xf85   :  { %v1008_v15 = vpop.permute.xlu1 %1007 }
 0xf86   :  { %v1010_v16 = vmul.f32 %v1008_v15, %v991_v13  ;;  %v1250_v15 = vld [vmem:[%s1911_s7] sm:$0xff]  ;;  %s1506_s7 = smov [#allocation3]  }
 0xf87   :  { %s1276_s15 = sshll.u32 %s1506_s7, 4  ;;  %s1277_s15 = int_to_ptr.vmem [resolvable:$true] %s1276_s15 }
 0xf88   :  { %1077 = vrot.lane.b32.xlu0 %v1010_v16, %s1502_s2 }
 0xfb3   :  { %v1071_v17 = vpop.permute.xlu2 %1070 }
 0xfb4   :  { %v1073_v18 = vmul.f32 %v1071_v17, %v1054_v36 }
 0xfb6   :  { %1140 = vrot.lane.b32.xlu1 %v1073_v18, %s1502_s2 }
 0xffa   :  { %v1078_v19 = vpop.permute.xlu0 %1077 }
 0xffb   :  { %1331 = vmatmul.msk.f32.vlgmr.msrb.gmra.mxu2 %vm186_vm10, %v1078_v19  ;;  %v1343_v19 = vld [vmem:[%s1910_s6] ss:$0 sm:$0xff]  ;;  %s1278_s6 = sshll.u32 %s1912_s8, 4  ;;  %s1279_s6 = int_to_ptr.hbm [resolvable:$true] %s1278_s6 }
0x1028   :  { %v1141_v20 = vpop.permute.xlu1 %1140 }
0x1029   :  { %1333 = vmatmul.msk.f32.vlgmr.msrb.gmra.mxu3 %vm186_vm10, %v1141_v20 }
0x107e   :  { %v1098_v27 = vpop.f32.mrf.mxu2 }
0x107f   :  { %v1101_v28 = vadd.f32 %v1098_v27, %v117_v25 }
0x1081   :  { %1456 = vtanh.f32 %v1101_v28  ;;  %v1332_v43 = vmul.f32 -1.442695, %v1101_v28 }
0x1087   :  { %v1457_v32 = vpop.eup %1456 }
0x1088   :  { %1124 = vrot.lane.b32.xlu2 %v1457_v32, %s1501_s0 }
0x10ac   :  { %v1161_v33 = vpop.f32.mrf.mxu3 }
0x10ad   :  { %v1164_v39 = vadd.f32 %v1161_v33, %v1665_v22 }
0x10af   :  { %1458 = vtanh.f32 %v1164_v39  ;;  %v1334_v49 = vmul.f32 -1.442695, %v1164_v39 }
0x10b0   :  { %1460 = vpow2.f32 %v1332_v43 }
0x10b5   :  { %v1459_v24 = vpop.eup %1458 }
0x10b6   :  { %1187 = vrot.lane.b32.xlu0 %v1459_v24, %s1501_s0  ;;  %v1461_v44 = vpop.eup %1460 }
0x10b7   :  { %v1105_v29 = vadd.f32 1.0, %v1461_v44 }
0x10b9   :  { %1462 = vrcp.f32 %v1105_v29  ;;  %v1117_v37 = vand.u32 2147483648, %v1105_v29  ;;  %vm1111_vm15 = vweird.f32 %v1105_v29  ;;  %v1115_v47 = vand.u32 2147483647, %v1105_v29 }
0x10ba   :  { %1464 = vpow2.f32 %v1334_v49 }
0x10bb   :  { %v1118_v42 = vor.u32 1.1754944e-38, %v1117_v37  ;;  %vm1116_vm1 = vcmp.eq.f32.partialorder %v1115_v47, 8.507059e+37 }
0x10bf   :  { %v1463_v45 = vpop.eup %1462 }
0x10c0   :  { %v1107_v23 = vmul.f32 %v1463_v45, %v1105_v29  ;;  %vm1112_vm14 = vweird.f32 %v1463_v45  ;;  %v1465_v3 = vpop.eup %1464 }
0x10c1   :  { %vm1113_vm0 = vmor %vm1111_vm15, %vm1112_vm14  ;;  %v1168_v4 = vadd.f32 1.0, %v1465_v3 }
0x10c2   :  { %v1108_v35 = vsub.f32 1.0, %v1107_v23 }
0x10c3   :  { %1466 = vrcp.f32 %v1168_v4  ;;  %v1180_v10 = vand.u32 2147483648, %v1168_v4  ;;  %vm1174_vm3 = vweird.f32 %v1168_v4  ;;  %v1178_v12 = vand.u32 2147483647, %v1168_v4 }
0x10c4   :  { %v1109_v46 = vmul.f32 %v1463_v45, %v1108_v35 }
0x10c5   :  { %v1181_v52 = vor.u32 1.1754944e-38, %v1180_v10  ;;  %vm1179_vm5 = vcmp.eq.f32.partialorder %v1178_v12, 8.507059e+37 }
0x10c6   :  { %v1110_v41 = vadd.f32 %v1463_v45, %v1109_v46 }
0x10c8   :  { %v1114_v22 = vsel %vm1113_vm0, %v1463_v45, %v1110_v41 }
0x10c9   :  { %v1119_v30 = vsel %vm1116_vm1, %v1118_v42, %v1114_v22  ;;  %v1467_v6 = vpop.eup %1466 }
0x10ca   :  { %v1170_v50 = vmul.f32 %v1467_v6, %v1168_v4  ;;  %vm1175_vm2 = vweird.f32 %v1467_v6  ;;  %v1122_v56 = vmul.f32 %v1119_v30, %v1845_v2  ;;  %v1216_v2 = vld [vmem:[%s1909_s5 + $0x28] sm:$0xff] }
0x10cb   :  { %vm1176_vm4 = vmor %vm1174_vm3, %vm1175_vm2  ;;  %1237 = vmatpush.msrb.mxu0 %v1216_v2 }
0x10cc   :  { %v1171_v9 = vsub.f32 1.0, %v1170_v50 }
0x10cd   :  { %1238 = vmatpush.msrb.mxu0 %v1215_v5 }
0x10ce   :  { %v1172_v51 = vmul.f32 %v1467_v6, %v1171_v9 }
0x10cf   :  { %1239 = vmatpush.msrb.mxu0 %v1214_v7 }
0x10d0   :  { %v1173_v26 = vadd.f32 %v1467_v6, %v1172_v51 }
0x10d1   :  { %1240 = vmatpush.msrb.mxu0 %v1213_v8 }
0x10d2   :  { %v1177_v13 = vsel %vm1176_vm4, %v1467_v6, %v1173_v26 }
0x10d3   :  { %v1182_v54 = vsel %vm1179_vm5, %v1181_v52, %v1177_v13 }
0x10d4   :  { %v1185_v59 = vmul.f32 %v1182_v54, %v1850_v11  ;;  %v1212_v11 = vld [vmem:[%s1909_s5 + $0x8] sm:$0xff]  ;;  %s1505_s5 = smov 112  }
0x10d5   :  { %1241 = vmatpush.msrb.mxu0 %v1212_v11 }
0x10d7   :  { %1242 = vmatpush.msrb.mxu0 %v1211_v14 }
0x10e2   :  { %v1125_v48 = vpop.permute.xlu2 %1124 }
0x10e3   :  { %v1127_v1 = vmul.f32 %v1125_v48, %v1119_v30 }
0x10e5   :  { %1129 = vrot.lane.b32.xlu1 %v1127_v1, %s1501_s0 }
0x1128   :  { %v1188_v53 = vpop.permute.xlu0 %1187 }
0x1129   :  { %v1190_v55 = vmul.f32 %v1188_v53, %v1182_v54 }
0x112b   :  { %1192 = vrot.lane.b32.xlu2 %v1190_v55, %s1501_s0 }
0x1157   :  { %v1130_v57 = vpop.permute.xlu1 %1129 }
0x1158   :  { %v1132_v31 = vadd.f32 %v1130_v57, %v1122_v56 }
0x115a   :  { %1468 = vtanh.f32 %v1132_v31 }
0x1160   :  { %v1469_v58 = vpop.eup %1468 }
0x1161   :  { %1135 = vrot.lane.b32.xlu0 %v1469_v58, %s1501_s0 }
0x1185   :  { %v1193_v40 = vpop.permute.xlu2 %1192 }
0x1186   :  { %v1195_v60 = vadd.f32 %v1193_v40, %v1185_v59 }
0x1188   :  { %1470 = vtanh.f32 %v1195_v60 }
0x118e   :  { %v1471_v61 = vpop.eup %1470 }
0x118f   :  { %1198 = vrot.lane.b32.xlu1 %v1471_v61, %s1501_s0 }
0x1197   :  { %1252 = vrot.lane.b32.xlu1 %v1250_v15, %s1504_s12 }
0x11d3   :  { %v1136_v38 = vpop.permute.xlu0 %1135 }
0x11d4   :  { %v1138_v62 = vmul.f32 %v1136_v38, %v1119_v30 }
0x11d6   :  { %1203 = vrot.lane.b32.xlu2 %v1138_v62, %s1502_s2 }
0x1201   :  { %v1199_v36 = vpop.permute.xlu1 %1198 }
0x1202   :  { %v1201_v34 = vmul.f32 %v1199_v36, %v1182_v54 }
0x1204   :  { %1207 = vrot.lane.b32.xlu0 %v1201_v34, %s1503_s18 }
0x1209   :  { %v1253_v28 = vpop.permute.xlu1 %1252 }
0x1230   :  { %v1204_v16 = vpop.permute.xlu2 %1203 }
0x1276   :  { %v1208_v17 = vpop.permute.xlu0 %1207 }
0x1277   :  { %v1210_v18 = vsel %vm186_vm10, %v1204_v16, %v1208_v17 }
0x1278   :  { %1335 = vmatmul.msk.f32.vlgmr.msrb.gmra.mxu0 %vm1223_vm6, %v1210_v18 }
0x12f5   :  { %v1244_v20 = vpop.f32.mrf.mxu0 }
0x12f6   :  { %v1245_v21 = vadd.f32 %v1343_v19, %v1244_v20 }
0x12f8   :  { %v1247_v25 = vmul.f32 0.5, %v1245_v21  ;;  %1262 = vrot.lane.b32.xlu0 %v1245_v21, %s1504_s12 }
0x12fa   :  { %v1248_v27 = vmul.f32 1.442695, %v1247_v25 }
0x12fc   :  { %1472 = vpow2.f32 %v1248_v27 }
0x1302   :  { %v1473_v32 = vpop.eup %1472 }
0x1303   :  { %v1255_v33 = vmul.f32 %v1473_v32, %v1253_v28 }
0x1305   :  { %1257 = vrot.lane.b32.xlu2 %v1255_v33, %s1505_s5 }
0x135f   :  { %v1258_v39 = vpop.permute.xlu2 %1257 }
0x1360   :  { %v1260_v24 = vadd.f32 %v1258_v39, %v1245_v21 }
0x136a   :  { %v1263_v43 = vpop.permute.xlu0 %1262 }
0x136b   :  { %v1266_v44 = vsel %vm1265_vm7, %v1260_v24, %v1263_v43 }
0x136c   :  { %v1267_v29 = vsel %vm186_vm10, %v1266_v44, %v1263_v43 }
0x136d   :  { %v1269_v45 = vsel %vm1268_vm8, %v1267_v29, 0.0 }
0x136e   :  { %1270 = vst [vmem:[#allocation3] sm:$0xff] %v1269_v45 }
0x136f   :  { %1281 = dma.vmem_to_hbm [thread:$0]  %s1277_s15, 128, %s1279_s6, [#allocation4]  }
0x1370   :  { %1498 = dma.done.wait [#allocation4], 128  }
0x1371   :  { %1499 = vsyncadd [#allocation4], 4294967168 }
0x1372   :  { %1286 = vsyncpa [#allocation4], 1 }

</bundles_post_ra>
